<compile_context>
chip_gen: v7x
topology: tpu7x:2x2x1
jax: 0.10.0
libtpu: 0.0.40
codegen_flags: <defaults>
</compile_context>

<pallas_src>
import functools

import numpy as np

import jax
import jax.numpy as jnp
from jax.experimental import pallas as pl
from jax.experimental.pallas import tpu as pltpu


def _kernel(prev_ref, cur_ref, nxt_ref, wt_ref, mask_ref, s_ref, o_ref, pad_ref,
            *, k, pad, W, th, r, co, C, T, HF, Wc):
    """One grid step = one (batch element, row strip of `th` image rows).

    prev_ref: (1, C, HF)          last HF flat elements of the strip above (clamped)
    cur_ref:  (1, C, th*W)        this strip, rows flattened onto the lane dim
    nxt_ref:  (1, C, HF)          first HF flat elements of the strip below (clamped)
    wt_ref:   (Cout, k*k*C + 1)   conv weight, out-channels reordered to (i, j, c);
                                  last contraction column = bias
    mask_ref: (k, th*W)           0/1 column-validity masks (one per kw tap)
    s_ref:    (r*Wc, Wc*r)        tiny 0/1 column-interleave matrix (w*r + j placement)
    o_ref:    (1, co, th*W*r*r)   pixel-shuffled NCHW output strip (flat, lane dense)
    pad_ref:  (C, th*W + 2*PF)    scratch: zero-padded flat halo window
    """
    t = pl.program_id(1)
    thW = th * W
    PF = pad * W + pad
    kkC = k * k * C
    Cout = co * r * r
    Wr = W * r
    cdt = pad_ref.dtype
    odt = o_ref.dtype

    # ---- zero-padded flat window ('same' padding); each region written exactly once ----
    pad_ref[:, PF:PF + thW] = cur_ref[0]

    @pl.when(t == 0)
    def _():
        pad_ref[:, 0:PF] = jnp.zeros((C, PF), cdt)

    @pl.when(t > 0)
    def _():
        pad_ref[:, 0:PF] = prev_ref[0, :, HF - PF:]

    @pl.when(t == T - 1)
    def _():
        pad_ref[:, PF + thW:] = jnp.zeros((C, PF), cdt)

    @pl.when(t < T - 1)
    def _():
        pad_ref[:, PF + thW:] = nxt_ref[0, :, 0:PF]

    # ---- conv over the flat window ----
    masks = mask_ref[...]                                    # (k, thW), loaded once
    bmask = [None] * k                                       # hoisted broadcasts (review)
    for kw in range(k):
        if kw != pad:
            bmask[kw] = jnp.broadcast_to(masks[kw:kw + 1, :], (C, thW))

    def tap(kh, kw):
        # one contiguous flat slice per conv tap; wrapped columns zeroed by the mask
        off = PF + (kh - pad) * W + (kw - pad)               # static, >= 0
        v = pad_ref[:, off:off + thW]
        if kw != pad:
            v = v * bmask[kw]
        return v

    if C >= 32:
        # Large C: accumulate k^2 matmuls straight off the window -- no im2col patch
        # materialization (saves k^2*C*thW stores; v5e store-slot review item).
        conv = jnp.zeros((Cout, thW), jnp.float32)
        for kh in range(k):
            for kw in range(k):
                s = kh * k + kw
                conv = conv + jnp.dot(wt_ref[:, s * C:(s + 1) * C], tap(kh, kw),
                                      preferred_element_type=jnp.float32)
        conv = conv + wt_ref[:, kkC:kkC + 1].astype(jnp.float32)      # bias column
    else:
        # Small C: one wide MXU matmul; bias carried by a trailing ones row.
        rows = [tap(kh, kw) for kh in range(k) for kw in range(k)]
        rows.append(jnp.ones((1, thW), cdt))
        patch = jnp.concatenate(rows, axis=0)                         # (kkC+1, thW)
        conv = jnp.dot(wt_ref[...], patch,
                       preferred_element_type=jnp.float32)            # (Cout, thW)

    # ---- fused pixel_shuffle epilogue (no strip-sized scatter matrices) ----
    # Row interleave: output row y = h*r + i is a contiguous Wr-lane span of the flat
    # output block.  Column interleave: tiny 0/1 matrix S places value (i, j, w) at lane
    # w*r + j on the otherwise-idle MXU; S is bf16, grid-invariant and single-buffered.
    S = s_ref[...]
    sdt = S.dtype
    ngrp = W // Wc
    for h in range(th):
        for i in range(r):
            chunks = []
            for g in range(ngrp):
                base = h * W + g * Wc
                lhs = jnp.concatenate(
                    [conv[(i * r + j) * co:(i * r + j + 1) * co, base:base + Wc]
                     for j in range(r)], axis=1).astype(sdt)          # (co, r*Wc)
                chunks.append(jnp.dot(lhs, S, preferred_element_type=jnp.float32))
            row = chunks[0] if ngrp == 1 else jnp.concatenate(chunks, axis=1)
            y = h * r + i
            o_ref[0, :, y * Wr:(y + 1) * Wr] = row.astype(odt)        # (co, W*r)


def _halo_flat(thW, PF):
    """Smallest multiple of 128 that covers PF and divides thW (flat halo width)."""
    q = thW // 128
    for d in range(1, q + 1):
        if q % d == 0 and 128 * d >= PF:
            return 128 * d
    return thW


def _vmem_limit_bytes():
    """Generation-dependent VMEM budget (v7x: 64MiB physical, v5e/v6e: 128MiB)."""
    cap = None
    try:
        info = pltpu.get_tpu_info()
        cap = getattr(info, "vmem_capacity_bytes", None)
    except Exception:
        cap = None
    if not cap:
        cap = 64 * 1024 * 1024                       # conservative (v7x-sized) default
    return max(32 * 1024 * 1024, min(int(cap) * 3 // 4, 100 * 1024 * 1024))


def _pick_row_tile(H, W, C, co, r, k, pad, cbytes, obytes, budget):
    """Largest row strip (divisor of H) whose working set fits the VMEM budget,
    targeting ~512-1024 lanes and keeping >= 2 strips per image when possible."""
    PF = pad * W + pad
    Cout = co * r * r

    def vmem_use(th):
        thW = th * W
        T = H // th
        hf = thW if T == 1 else _halo_flat(thW, PF)
        use = 2 * C * thW * cbytes                   # current strip (double buffered)
        use += 2 * 2 * C * hf * cbytes               # prev/next halos (double buffered)
        use += 2 * co * thW * r * r * obytes         # output strip (double buffered)
        use += C * (thW + 2 * PF) * cbytes           # padded-window scratch
        use += Cout * (k * k * C + 1) * cbytes       # weight (single buffered)
        use += k * thW * cbytes                      # column masks
        use += Cout * thW * 4                        # f32 conv value (vregs / spill)
        return use

    cands = [th for th in range(1, H + 1)
             if H % th == 0 and (th * W) % 128 == 0 and th * W >= PF
             and vmem_use(th) <= budget]
    if not cands:
        # TODO(synk): when no divisor of H gives a 128-multiple strip, pad W in the
        # wrapper instead of collapsing to a single strip per image.
        return H
    pref = [th for th in cands if th * W <= 1024 and H // th >= 2]
    if pref:
        return max(pref)
    pref = [th for th in cands if th * W <= 1024]
    if pref:
        return max(pref)
    return min(cands)


def pixel_shuffle_pack(x, weight, bias, scale_factor, *, row_tile=None):
    """Forward pass of PixelShufflePack.

    Args:
      x:      (N, C_in, H, W)             NCHW, like PyTorch.
      weight: (k, k, C_in, C_out * r^2)   conv weight, HWIO layout.
      bias:   (C_out * r^2,)
      scale_factor: int r.
      row_tile: optional rows per grid step (must divide H).
    Returns:
      (N, C_out, H*r, W*r), dtype of x.
    """
    N, C, H, W = x.shape
    k = weight.shape[0]
    Cout = weight.shape[-1]
    r = int(scale_factor)
    co = Cout // (r * r)
    pad = (k - 1) // 2
    if k % 2 != 1:
        # TODO(synk): even kernel sizes need asymmetric 'same' padding (PyTorch pads
        # symmetrically with (k-1)//2); only odd k is supported here.
        raise NotImplementedError("upsample_kernel must be odd")
    PF = pad * W + pad

    # bf16 conv with f32 accumulation (review): halves HBM reads + VMEM and uses the
    # MXU's native bf16 path.  In a real model the activations are typically already
    # bf16, which makes the cast below free.
    cdt = jnp.bfloat16
    odt = x.dtype
    cbytes = 2
    obytes = jnp.dtype(odt).itemsize

    vmem_limit = _vmem_limit_bytes()
    if row_tile is None:
        th = _pick_row_tile(H, W, C, co, r, k, pad, cbytes, obytes,
                            budget=vmem_limit // 2)
    else:
        th = int(row_tile)
        if H % th != 0:
            raise ValueError("row_tile must divide H")
    T = H // th
    thW = th * W
    if thW < PF:
        # Halo must be confined to the immediately adjacent strip (review concern).
        raise ValueError(f"row strip too small: th*W={thW} < pad*W+pad={PF}")
    if T > 1 and thW % 128 != 0:
        raise ValueError("th*W must be a multiple of 128 when H is split into strips")
    HF = thW if T == 1 else _halo_flat(thW, PF)
    m = thW // HF

    # Conv weight: HWIO -> (k*k*C, Cout) with output channels reordered from PyTorch's
    # (c, i, j) to (i, j, c) so each sub-pixel's channels are contiguous rows of the
    # matmul result; bias appended as an extra contraction column.
    w_flat = weight.astype(cdt).reshape(k * k * C, Cout)
    w_re = jnp.transpose(w_flat.reshape(k * k * C, co, r * r),
                         (0, 2, 1)).reshape(k * k * C, Cout)
    b_re = jnp.transpose(bias.astype(cdt).reshape(co, r * r),
                         (1, 0)).reshape(1, Cout)
    wt = jnp.transpose(jnp.concatenate([w_re, b_re], axis=0), (1, 0))  # (Cout, kkC+1)

    # 0/1 column-validity masks for 'same' padding (one per kw tap), built on host.
    col = np.arange(thW) % W
    col_mask = np.stack(
        [((col + (kw - pad) >= 0) & (col + (kw - pad) < W)) for kw in range(k)],
        axis=0).astype(np.float32)
    col_mask = jnp.asarray(col_mask, dtype=cdt)                        # (k, thW)

    # Tiny 0/1 column-interleave matrix: S[j*Wc + w, w*r + j] = 1.  The pattern is
    # periodic in the image column, so Wc (<= 128) chunks keep it independent of W / th.
    Wc = W
    if W > 128:
        for d in range(128, 0, -1):
            if W % d == 0:
                Wc = d
                break
    s_np = np.zeros((r * Wc, Wc * r), np.float32)
    for j in range(r):
        for w in range(Wc):
            s_np[j * Wc + w, w * r + j] = 1.0
    S = jnp.asarray(s_np, dtype=cdt)                                   # (r*Wc, Wc*r)

    x_flat = x.astype(cdt).reshape(N, C, H * W)   # free reshape; rows on the lane dim

    kernel = functools.partial(_kernel, k=k, pad=pad, W=W, th=th, r=r, co=co, C=C,
                               T=T, HF=HF, Wc=Wc)

    def _invariant_spec(shape):
        # Grid-invariant inputs: single-buffer them to save VMEM (review item).
        idx = lambda n, t: (0, 0)
        buffered = getattr(pl, "Buffered", None)
        if buffered is not None:
            try:
                return pl.BlockSpec(shape, idx, pipeline_mode=buffered(1))
            except (TypeError, ValueError):
                pass
        return pl.BlockSpec(shape, idx)

    grid_spec = pltpu.PrefetchScalarGridSpec(
        num_scalar_prefetch=0,
        grid=(N, T),
        in_specs=[
            # pad-row halos from the strips above / below (clamped at the image edges;
            # the kernel zero-fills there) -- only HF flat elements, not a full strip.
            pl.BlockSpec((1, C, HF),
                         lambda n, t: (n, 0, jnp.maximum(t * m - 1, 0))),
            pl.BlockSpec((1, C, thW), lambda n, t: (n, 0, t)),
            pl.BlockSpec((1, C, HF),
                         lambda n, t: (n, 0, jnp.minimum((t + 1) * m,
                                                         (H * W) // HF - 1))),
            _invariant_spec((Cout, k * k * C + 1)),
            _invariant_spec((k, thW)),
            _invariant_spec((r * Wc, Wc * r)),
        ],
        out_specs=pl.BlockSpec((1, co, thW * r * r), lambda n, t: (n, 0, t)),
        scratch_shapes=[pltpu.VMEM((C, thW + 2 * PF), cdt)],
    )

    out_flat = pl.pallas_call(
        kernel,
        out_shape=jax.ShapeDtypeStruct((N, co, H * W * r * r), odt),
        grid_spec=grid_spec,
        compiler_params=pltpu.CompilerParams(
            dimension_semantics=("parallel", "parallel"),
            vmem_limit_bytes=vmem_limit,
        ),
    )(x_flat, x_flat, x_flat, wt, col_mask, S)

    # Free reshape only -- the kernel already wrote the pixel-shuffled NCHW layout.
    return out_flat.reshape(N, co, H * r, W * r)


def _reference(x, weight, bias, scale_factor):
    """Pure-JAX reference (lax conv + pixel shuffle) for correctness check."""
    conv = jax.lax.conv_general_dilated(
        x, weight,
        window_strides=(1, 1),
        padding="SAME",
        dimension_numbers=("NCHW", "HWIO", "NCHW"),
    ) + bias[None, :, None, None]
    N, Ctot, H, W = conv.shape
    r = scale_factor
    co = Ctot // (r * r)
    y = conv.reshape(N, co, r, r, H, W)
    y = jnp.transpose(y, (0, 1, 4, 2, 5, 3))     # (N, co, H, r, W, r)
    return y.reshape(N, co, H * r, W * r)


if __name__ == "__main__":
    # Module hyper-params (mirrors PixelShufflePack.__init__).
    in_channels = 4
    out_channels = 4
    scale_factor = 2
    upsample_kernel = 3

    key = jax.random.PRNGKey(0)
    kx, kw = jax.random.split(key)

    # Input (n, c, h, w) like PyTorch.
    x = jax.random.normal(kx, (2, in_channels, 16, 16), dtype=jnp.float32)

    # Deterministic kaiming-normal init (fan_in, relu gain), bias = 0,
    # matching default_init_weights(scale=1) semantics.
    fan_in = in_channels * upsample_kernel * upsample_kernel
    std = (2.0 / fan_in) ** 0.5
    cout_total = out_channels * scale_factor * scale_factor
    weight = std * jax.random.normal(
        kw, (upsample_kernel, upsample_kernel, in_channels, cout_total),
        dtype=jnp.float32)
    bias = jnp.zeros((cout_total,), dtype=jnp.float32)

    out = pixel_shuffle_pack(x, weight, bias, scale_factor)
    out = jax.block_until_ready(out)

    # The kernel computes in bf16 with f32 accumulation; compare against an f32
    # reference fed bf16-rounded inputs (tight) and the pure-f32 reference (loose).
    ref_bf16 = _reference(x.astype(jnp.bfloat16).astype(jnp.float32),
                          weight.astype(jnp.bfloat16).astype(jnp.float32),
                          bias, scale_factor)
    ref_f32 = _reference(x, weight, bias, scale_factor)

    assert out.shape == (2, out_channels, 16 * scale_factor, 16 * scale_factor), out.shape
    assert jnp.allclose(out, ref_bf16, atol=2e-2, rtol=2e-2), "mismatch vs bf16 reference"
    assert jnp.allclose(out, ref_f32, atol=6e-2, rtol=6e-2), "mismatch vs f32 reference"

    print("KERNEL_OK")
</pallas_src>

<mosaic_0001>
module attributes {stable_mosaic.version = 11 : i64} {
  func.func @_kernel(%arg0: i32, %arg1: i32, %arg2: memref<1x4x128xbf16, #tpu.memory_space<vmem>>, %arg3: memref<1x4x128xbf16, #tpu.memory_space<vmem>>, %arg4: memref<1x4x128xbf16, #tpu.memory_space<vmem>>, %arg5: memref<16x37xbf16, #tpu.memory_space<vmem>>, %arg6: memref<3x128xbf16, #tpu.memory_space<vmem>>, %arg7: memref<32x32xbf16, #tpu.memory_space<vmem>>, %arg8: memref<1x4x512xf32, #tpu.memory_space<vmem>>, %arg9: memref<4x162xbf16, #tpu.memory_space<vmem>>) attributes {dimension_semantics = [#tpu.dimension_semantics<parallel>, #tpu.dimension_semantics<parallel>], iteration_bounds = array<i64: 2, 2>, scalar_prefetch = 0 : i64, scratch_operands = 1 : i64, tpu.core_type = #tpu.core_type<tc>, window_params = [{transform_indices = @transform_0, window_bounds = array<i64: 1, 4, 128>}, {transform_indices = @transform_1, window_bounds = array<i64: 1, 4, 128>}, {transform_indices = @transform_2, window_bounds = array<i64: 1, 4, 128>}, {pipeline_mode = #tpu.pipeline_mode<synchronous>, transform_indices = @transform_3, window_bounds = array<i64: 16, 37>}, {pipeline_mode = #tpu.pipeline_mode<synchronous>, transform_indices = @transform_4, window_bounds = array<i64: 3, 128>}, {pipeline_mode = #tpu.pipeline_mode<synchronous>, transform_indices = @transform_5, window_bounds = array<i64: 32, 32>}, {transform_indices = @transform_6, window_bounds = array<i64: 1, 4, 512>}]} {
    %c0 = arith.constant 0 : index
    %c0_0 = arith.constant 0 : index
    %c0_1 = arith.constant 0 : index
    %0 = vector.load %arg3[%c0, %c0_0, %c0_1] : memref<1x4x128xbf16, #tpu.memory_space<vmem>>, vector<1x4x128xbf16>
    %1 = vector.shape_cast %0 : vector<1x4x128xbf16> to vector<4x128xbf16>
    %c0_2 = arith.constant 0 : index
    %c17 = arith.constant 17 : index
    %2 = vector.load %arg9[%c0_2, %c17] : memref<4x162xbf16, #tpu.memory_space<vmem>>, vector<4x128xbf16>
    tpu.vector_store %arg9[%c0_2, %c17], %1 {strides = array<i32>} : memref<4x162xbf16, #tpu.memory_space<vmem>>, vector<4x128xbf16>,
    %c0_i32 = arith.constant 0 : i32
    %3 = arith.cmpi eq, %arg1, %c0_i32 : i32
    %4 = arith.extui %3 : i1 to i32
    %c0_i32_3 = arith.constant 0 : i32
    %5 = arith.cmpi ne, %4, %c0_i32_3 : i32
    scf.if %5 {
      %cst_77 = arith.constant 0.000000e+00 : bf16
      %170 = vector.broadcast %cst_77 : bf16 to vector<4x17xbf16>
      %c0_78 = arith.constant 0 : index
      %c0_79 = arith.constant 0 : index
      %171 = vector.load %arg9[%c0_78, %c0_79] : memref<4x162xbf16, #tpu.memory_space<vmem>>, vector<4x17xbf16>
      tpu.vector_store %arg9[%c0_78, %c0_79], %170 {strides = array<i32>} : memref<4x162xbf16, #tpu.memory_space<vmem>>, vector<4x17xbf16>,
    } else {
    }
    %c0_i32_4 = arith.constant 0 : i32
    %6 = arith.cmpi sgt, %arg1, %c0_i32_4 : i32
    %7 = arith.extui %6 : i1 to i32
    %c0_i32_5 = arith.constant 0 : i32
    %8 = arith.cmpi ne, %7, %c0_i32_5 : i32
    scf.if %8 {
      %c0_77 = arith.constant 0 : index
      %c0_78 = arith.constant 0 : index
      %c111 = arith.constant 111 : index
      %170 = vector.load %arg2[%c0_77, %c0_78, %c111] : memref<1x4x128xbf16, #tpu.memory_space<vmem>>, vector<1x4x17xbf16>
      %171 = vector.shape_cast %170 : vector<1x4x17xbf16> to vector<4x17xbf16>
      %c0_79 = arith.constant 0 : index
      %c0_80 = arith.constant 0 : index
      %172 = vector.load %arg9[%c0_79, %c0_80] : memref<4x162xbf16, #tpu.memory_space<vmem>>, vector<4x17xbf16>
      tpu.vector_store %arg9[%c0_79, %c0_80], %171 {strides = array<i32>} : memref<4x162xbf16, #tpu.memory_space<vmem>>, vector<4x17xbf16>,
    } else {
    }
    %c1_i32 = arith.constant 1 : i32
    %9 = arith.cmpi eq, %arg1, %c1_i32 : i32
    %10 = arith.extui %9 : i1 to i32
    %c0_i32_6 = arith.constant 0 : i32
    %11 = arith.cmpi ne, %10, %c0_i32_6 : i32
    scf.if %11 {
      %cst_77 = arith.constant 0.000000e+00 : bf16
      %170 = vector.broadcast %cst_77 : bf16 to vector<4x17xbf16>
      %c0_78 = arith.constant 0 : index
      %c145 = arith.constant 145 : index
      %171 = vector.load %arg9[%c0_78, %c145] : memref<4x162xbf16, #tpu.memory_space<vmem>>, vector<4x17xbf16>
      tpu.vector_store %arg9[%c0_78, %c145], %170 {strides = array<i32>} : memref<4x162xbf16, #tpu.memory_space<vmem>>, vector<4x17xbf16>,
    } else {
    }
    %c1_i32_7 = arith.constant 1 : i32
    %12 = arith.cmpi slt, %arg1, %c1_i32_7 : i32
    %13 = arith.extui %12 : i1 to i32
    %c0_i32_8 = arith.constant 0 : i32
    %14 = arith.cmpi ne, %13, %c0_i32_8 : i32
    scf.if %14 {
      %c0_77 = arith.constant 0 : index
      %c0_78 = arith.constant 0 : index
      %c0_79 = arith.constant 0 : index
      %170 = vector.load %arg4[%c0_77, %c0_78, %c0_79] : memref<1x4x128xbf16, #tpu.memory_space<vmem>>, vector<1x4x17xbf16>
      %171 = vector.shape_cast %170 : vector<1x4x17xbf16> to vector<4x17xbf16>
      %c0_80 = arith.constant 0 : index
      %c145 = arith.constant 145 : index
      %172 = vector.load %arg9[%c0_80, %c145] : memref<4x162xbf16, #tpu.memory_space<vmem>>, vector<4x17xbf16>
      tpu.vector_store %arg9[%c0_80, %c145], %171 {strides = array<i32>} : memref<4x162xbf16, #tpu.memory_space<vmem>>, vector<4x17xbf16>,
    } else {
    }
    %c0_9 = arith.constant 0 : index
    %c0_10 = arith.constant 0 : index
    %15 = vector.load %arg6[%c0_9, %c0_10] : memref<3x128xbf16, #tpu.memory_space<vmem>>, vector<3x128xbf16>
    %16 = vector.extract_strided_slice %15 {offsets = [0, 0], sizes = [1, 128], strides = [1, 1]} : vector<3x128xbf16> to vector<1x128xbf16>
    %17 = vector.shape_cast %16 : vector<1x128xbf16> to vector<1x128xbf16>
    %18 = vector.broadcast %17 : vector<1x128xbf16> to vector<4x128xbf16>
    %19 = vector.extract_strided_slice %15 {offsets = [2, 0], sizes = [1, 128], strides = [1, 1]} : vector<3x128xbf16> to vector<1x128xbf16>
    %20 = vector.shape_cast %19 : vector<1x128xbf16> to vector<1x128xbf16>
    %21 = vector.broadcast %20 : vector<1x128xbf16> to vector<4x128xbf16>
    %c0_11 = arith.constant 0 : index
    %c0_12 = arith.constant 0 : index
    %22 = vector.load %arg9[%c0_11, %c0_12] : memref<4x162xbf16, #tpu.memory_space<vmem>>, vector<4x128xbf16>
    %23 = arith.mulf %22, %18 : vector<4x128xbf16>
    %c0_13 = arith.constant 0 : index
    %c1 = arith.constant 1 : index
    %24 = vector.load %arg9[%c0_13, %c1] : memref<4x162xbf16, #tpu.memory_space<vmem>>, vector<4x128xbf16>
    %c0_14 = arith.constant 0 : index
    %c2 = arith.constant 2 : index
    %25 = vector.load %arg9[%c0_14, %c2] : memref<4x162xbf16, #tpu.memory_space<vmem>>, vector<4x128xbf16>
    %26 = arith.mulf %25, %21 : vector<4x128xbf16>
    %c0_15 = arith.constant 0 : index
    %c16 = arith.constant 16 : index
    %27 = vector.load %arg9[%c0_15, %c16] : memref<4x162xbf16, #tpu.memory_space<vmem>>, vector<4x128xbf16>
    %28 = arith.mulf %27, %18 : vector<4x128xbf16>
    %c0_16 = arith.constant 0 : index
    %c17_17 = arith.constant 17 : index
    %29 = vector.load %arg9[%c0_16, %c17_17] : memref<4x162xbf16, #tpu.memory_space<vmem>>, vector<4x128xbf16>
    %c0_18 = arith.constant 0 : index
    %c18 = arith.constant 18 : index
    %30 = vector.load %arg9[%c0_18, %c18] : memref<4x162xbf16, #tpu.memory_space<vmem>>, vector<4x128xbf16>
    %31 = arith.mulf %30, %21 : vector<4x128xbf16>
    %c0_19 = arith.constant 0 : index
    %c32 = arith.constant 32 : index
    %32 = vector.load %arg9[%c0_19, %c32] : memref<4x162xbf16, #tpu.memory_space<vmem>>, vector<4x128xbf16>
    %33 = arith.mulf %32, %18 : vector<4x128xbf16>
    %c0_20 = arith.constant 0 : index
    %c33 = arith.constant 33 : index
    %34 = vector.load %arg9[%c0_20, %c33] : memref<4x162xbf16, #tpu.memory_space<vmem>>, vector<4x128xbf16>
    %c0_21 = arith.constant 0 : index
    %c34 = arith.constant 34 : index
    %35 = vector.load %arg9[%c0_21, %c34] : memref<4x162xbf16, #tpu.memory_space<vmem>>, vector<4x128xbf16>
    %36 = arith.mulf %35, %21 : vector<4x128xbf16>
    %cst = arith.constant 1.000000e+00 : bf16
    %37 = vector.broadcast %cst : bf16 to vector<1x128xbf16>
    %38 = tpu.concatenate %23, %24, %26, %28, %29, %31, %33, %34, %36, %37 in 0 : vector<4x128xbf16>, vector<4x128xbf16>, vector<4x128xbf16>, vector<4x128xbf16>, vector<4x128xbf16>, vector<4x128xbf16>, vector<4x128xbf16>, vector<4x128xbf16>, vector<4x128xbf16>, vector<1x128xbf16> -> vector<37x128xbf16>
    %c0_22 = arith.constant 0 : index
    %c0_23 = arith.constant 0 : index
    %39 = vector.load %arg5[%c0_22, %c0_23] : memref<16x37xbf16, #tpu.memory_space<vmem>>, vector<16x37xbf16>
    %cst_24 = arith.constant dense<0.000000e+00> : vector<16x128xf32>
    %40 = tpu.matmul %39, %38, %cst_24 {dimension_numbers = #tpu.dot_dimension_numbers<[1], [0], [0], [1], [0, 0, 1, 1], [], []>} : vector<16x37xbf16>, vector<37x128xbf16>, vector<16x128xf32> -> vector<16x128xf32>
    %c0_25 = arith.constant 0 : index
    %c0_26 = arith.constant 0 : index
    %41 = vector.load %arg7[%c0_25, %c0_26] : memref<32x32xbf16, #tpu.memory_space<vmem>>, vector<32x32xbf16>
    %42 = vector.extract_strided_slice %40 {offsets = [0, 0], sizes = [4, 16], strides = [1, 1]} : vector<16x128xf32> to vector<4x16xf32>
    %43 = vector.extract_strided_slice %40 {offsets = [4, 0], sizes = [4, 16], strides = [1, 1]} : vector<16x128xf32> to vector<4x16xf32>
    %44 = tpu.concatenate %42, %43 in 1 : vector<4x16xf32>, vector<4x16xf32> -> vector<4x32xf32>
    %45 = arith.truncf %44 : vector<4x32xf32> to vector<4x32xbf16>
    %cst_27 = arith.constant dense<0.000000e+00> : vector<4x32xf32>
    %46 = tpu.matmul %45, %41, %cst_27 {dimension_numbers = #tpu.dot_dimension_numbers<[1], [0], [0], [1], [0, 0, 1, 1], [], []>} : vector<4x32xbf16>, vector<32x32xbf16>, vector<4x32xf32> -> vector<4x32xf32>
    %c0_28 = arith.constant 0 : index
    %c0_29 = arith.constant 0 : index
    %c0_30 = arith.constant 0 : index
    %47 = vector.load %arg8[%c0_28, %c0_29, %c0_30] : memref<1x4x512xf32, #tpu.memory_space<vmem>>, vector<1x4x32xf32>
    %48 = vector.shape_cast %47 : vector<1x4x32xf32> to vector<4x32xf32>
    %49 = vector.shape_cast %46 : vector<4x32xf32> to vector<1x4x32xf32>
    tpu.vector_store %arg8[%c0_28, %c0_29, %c0_30], %49 {strides = array<i32>} : memref<1x4x512xf32, #tpu.memory_space<vmem>>, vector<1x4x32xf32>,
    %50 = vector.extract_strided_slice %40 {offsets = [8, 0], sizes = [4, 16], strides = [1, 1]} : vector<16x128xf32> to vector<4x16xf32>
    %51 = vector.extract_strided_slice %40 {offsets = [12, 0], sizes = [4, 16], strides = [1, 1]} : vector<16x128xf32> to vector<4x16xf32>
    %52 = tpu.concatenate %50, %51 in 1 : vector<4x16xf32>, vector<4x16xf32> -> vector<4x32xf32>
    %53 = arith.truncf %52 : vector<4x32xf32> to vector<4x32xbf16>
    %cst_31 = arith.constant dense<0.000000e+00> : vector<4x32xf32>
    %54 = tpu.matmul %53, %41, %cst_31 {dimension_numbers = #tpu.dot_dimension_numbers<[1], [0], [0], [1], [0, 0, 1, 1], [], []>} : vector<4x32xbf16>, vector<32x32xbf16>, vector<4x32xf32> -> vector<4x32xf32>
    %c0_32 = arith.constant 0 : index
    %c0_33 = arith.constant 0 : index
    %c32_34 = arith.constant 32 : index
    %55 = vector.load %arg8[%c0_32, %c0_33, %c32_34] : memref<1x4x512xf32, #tpu.memory_space<vmem>>, vector<1x4x32xf32>
    %56 = vector.shape_cast %55 : vector<1x4x32xf32> to vector<4x32xf32>
    %57 = vector.shape_cast %54 : vector<4x32xf32> to vector<1x4x32xf32>
    tpu.vector_store %arg8[%c0_32, %c0_33, %c32_34], %57 {strides = array<i32>} : memref<1x4x512xf32, #tpu.memory_space<vmem>>, vector<1x4x32xf32>,
    %58 = vector.extract_strided_slice %40 {offsets = [0, 16], sizes = [4, 16], strides = [1, 1]} : vector<16x128xf32> to vector<4x16xf32>
    %59 = vector.extract_strided_slice %40 {offsets = [4, 16], sizes = [4, 16], strides = [1, 1]} : vector<16x128xf32> to vector<4x16xf32>
    %60 = tpu.concatenate %58, %59 in 1 : vector<4x16xf32>, vector<4x16xf32> -> vector<4x32xf32>
    %61 = arith.truncf %60 : vector<4x32xf32> to vector<4x32xbf16>
    %cst_35 = arith.constant dense<0.000000e+00> : vector<4x32xf32>
    %62 = tpu.matmul %61, %41, %cst_35 {dimension_numbers = #tpu.dot_dimension_numbers<[1], [0], [0], [1], [0, 0, 1, 1], [], []>} : vector<4x32xbf16>, vector<32x32xbf16>, vector<4x32xf32> -> vector<4x32xf32>
    %c0_36 = arith.constant 0 : index
    %c0_37 = arith.constant 0 : index
    %c64 = arith.constant 64 : index
    %63 = vector.load %arg8[%c0_36, %c0_37, %c64] : memref<1x4x512xf32, #tpu.memory_space<vmem>>, vector<1x4x32xf32>
    %64 = vector.shape_cast %63 : vector<1x4x32xf32> to vector<4x32xf32>
    %65 = vector.shape_cast %62 : vector<4x32xf32> to vector<1x4x32xf32>
    tpu.vector_store %arg8[%c0_36, %c0_37, %c64], %65 {strides = array<i32>} : memref<1x4x512xf32, #tpu.memory_space<vmem>>, vector<1x4x32xf32>,
    %66 = vector.extract_strided_slice %40 {offsets = [8, 16], sizes = [4, 16], strides = [1, 1]} : vector<16x128xf32> to vector<4x16xf32>
    %67 = vector.extract_strided_slice %40 {offsets = [12, 16], sizes = [4, 16], strides = [1, 1]} : vector<16x128xf32> to vector<4x16xf32>
    %68 = tpu.concatenate %66, %67 in 1 : vector<4x16xf32>, vector<4x16xf32> -> vector<4x32xf32>
    %69 = arith.truncf %68 : vector<4x32xf32> to vector<4x32xbf16>
    %cst_38 = arith.constant dense<0.000000e+00> : vector<4x32xf32>
    %70 = tpu.matmul %69, %41, %cst_38 {dimension_numbers = #tpu.dot_dimension_numbers<[1], [0], [0], [1], [0, 0, 1, 1], [], []>} : vector<4x32xbf16>, vector<32x32xbf16>, vector<4x32xf32> -> vector<4x32xf32>
    %c0_39 = arith.constant 0 : index
    %c0_40 = arith.constant 0 : index
    %c96 = arith.constant 96 : index
    %71 = vector.load %arg8[%c0_39, %c0_40, %c96] : memref<1x4x512xf32, #tpu.memory_space<vmem>>, vector<1x4x32xf32>
    %72 = vector.shape_cast %71 : vector<1x4x32xf32> to vector<4x32xf32>
    %73 = vector.shape_cast %70 : vector<4x32xf32> to vector<1x4x32xf32>
    tpu.vector_store %arg8[%c0_39, %c0_40, %c96], %73 {strides = array<i32>} : memref<1x4x512xf32, #tpu.memory_space<vmem>>, vector<1x4x32xf32>,
    %74 = vector.extract_strided_slice %40 {offsets = [0, 32], sizes = [4, 16], strides = [1, 1]} : vector<16x128xf32> to vector<4x16xf32>
    %75 = vector.extract_strided_slice %40 {offsets = [4, 32], sizes = [4, 16], strides = [1, 1]} : vector<16x128xf32> to vector<4x16xf32>
    %76 = tpu.concatenate %74, %75 in 1 : vector<4x16xf32>, vector<4x16xf32> -> vector<4x32xf32>
    %77 = arith.truncf %76 : vector<4x32xf32> to vector<4x32xbf16>
    %cst_41 = arith.constant dense<0.000000e+00> : vector<4x32xf32>
    %78 = tpu.matmul %77, %41, %cst_41 {dimension_numbers = #tpu.dot_dimension_numbers<[1], [0], [0], [1], [0, 0, 1, 1], [], []>} : vector<4x32xbf16>, vector<32x32xbf16>, vector<4x32xf32> -> vector<4x32xf32>
    %c0_42 = arith.constant 0 : index
    %c0_43 = arith.constant 0 : index
    %c128 = arith.constant 128 : index
    %79 = vector.load %arg8[%c0_42, %c0_43, %c128] : memref<1x4x512xf32, #tpu.memory_space<vmem>>, vector<1x4x32xf32>
    %80 = vector.shape_cast %79 : vector<1x4x32xf32> to vector<4x32xf32>
    %81 = vector.shape_cast %78 : vector<4x32xf32> to vector<1x4x32xf32>
    tpu.vector_store %arg8[%c0_42, %c0_43, %c128], %81 {strides = array<i32>} : memref<1x4x512xf32, #tpu.memory_space<vmem>>, vector<1x4x32xf32>,
    %82 = vector.extract_strided_slice %40 {offsets = [8, 32], sizes = [4, 16], strides = [1, 1]} : vector<16x128xf32> to vector<4x16xf32>
    %83 = vector.extract_strided_slice %40 {offsets = [12, 32], sizes = [4, 16], strides = [1, 1]} : vector<16x128xf32> to vector<4x16xf32>
    %84 = tpu.concatenate %82, %83 in 1 : vector<4x16xf32>, vector<4x16xf32> -> vector<4x32xf32>
    %85 = arith.truncf %84 : vector<4x32xf32> to vector<4x32xbf16>
    %cst_44 = arith.constant dense<0.000000e+00> : vector<4x32xf32>
    %86 = tpu.matmul %85, %41, %cst_44 {dimension_numbers = #tpu.dot_dimension_numbers<[1], [0], [0], [1], [0, 0, 1, 1], [], []>} : vector<4x32xbf16>, vector<32x32xbf16>, vector<4x32xf32> -> vector<4x32xf32>
    %c0_45 = arith.constant 0 : index
    %c0_46 = arith.constant 0 : index
    %c160 = arith.constant 160 : index
    %87 = vector.load %arg8[%c0_45, %c0_46, %c160] : memref<1x4x512xf32, #tpu.memory_space<vmem>>, vector<1x4x32xf32>
    %88 = vector.shape_cast %87 : vector<1x4x32xf32> to vector<4x32xf32>
    %89 = vector.shape_cast %86 : vector<4x32xf32> to vector<1x4x32xf32>
    tpu.vector_store %arg8[%c0_45, %c0_46, %c160], %89 {strides = array<i32>} : memref<1x4x512xf32, #tpu.memory_space<vmem>>, vector<1x4x32xf32>,
    %90 = vector.extract_strided_slice %40 {offsets = [0, 48], sizes = [4, 16], strides = [1, 1]} : vector<16x128xf32> to vector<4x16xf32>
    %91 = vector.extract_strided_slice %40 {offsets = [4, 48], sizes = [4, 16], strides = [1, 1]} : vector<16x128xf32> to vector<4x16xf32>
    %92 = tpu.concatenate %90, %91 in 1 : vector<4x16xf32>, vector<4x16xf32> -> vector<4x32xf32>
    %93 = arith.truncf %92 : vector<4x32xf32> to vector<4x32xbf16>
    %cst_47 = arith.constant dense<0.000000e+00> : vector<4x32xf32>
    %94 = tpu.matmul %93, %41, %cst_47 {dimension_numbers = #tpu.dot_dimension_numbers<[1], [0], [0], [1], [0, 0, 1, 1], [], []>} : vector<4x32xbf16>, vector<32x32xbf16>, vector<4x32xf32> -> vector<4x32xf32>
    %c0_48 = arith.constant 0 : index
    %c0_49 = arith.constant 0 : index
    %c192 = arith.constant 192 : index
    %95 = vector.load %arg8[%c0_48, %c0_49, %c192] : memref<1x4x512xf32, #tpu.memory_space<vmem>>, vector<1x4x32xf32>
    %96 = vector.shape_cast %95 : vector<1x4x32xf32> to vector<4x32xf32>
    %97 = vector.shape_cast %94 : vector<4x32xf32> to vector<1x4x32xf32>
    tpu.vector_store %arg8[%c0_48, %c0_49, %c192], %97 {strides = array<i32>} : memref<1x4x512xf32, #tpu.memory_space<vmem>>, vector<1x4x32xf32>,
    %98 = vector.extract_strided_slice %40 {offsets = [8, 48], sizes = [4, 16], strides = [1, 1]} : vector<16x128xf32> to vector<4x16xf32>
    %99 = vector.extract_strided_slice %40 {offsets = [12, 48], sizes = [4, 16], strides = [1, 1]} : vector<16x128xf32> to vector<4x16xf32>
    %100 = tpu.concatenate %98, %99 in 1 : vector<4x16xf32>, vector<4x16xf32> -> vector<4x32xf32>
    %101 = arith.truncf %100 : vector<4x32xf32> to vector<4x32xbf16>
    %cst_50 = arith.constant dense<0.000000e+00> : vector<4x32xf32>
    %102 = tpu.matmul %101, %41, %cst_50 {dimension_numbers = #tpu.dot_dimension_numbers<[1], [0], [0], [1], [0, 0, 1, 1], [], []>} : vector<4x32xbf16>, vector<32x32xbf16>, vector<4x32xf32> -> vector<4x32xf32>
    %c0_51 = arith.constant 0 : index
    %c0_52 = arith.constant 0 : index
    %c224 = arith.constant 224 : index
    %103 = vector.load %arg8[%c0_51, %c0_52, %c224] : memref<1x4x512xf32, #tpu.memory_space<vmem>>, vector<1x4x32xf32>
    %104 = vector.shape_cast %103 : vector<1x4x32xf32> to vector<4x32xf32>
    %105 = vector.shape_cast %102 : vector<4x32xf32> to vector<1x4x32xf32>
    tpu.vector_store %arg8[%c0_51, %c0_52, %c224], %105 {strides = array<i32>} : memref<1x4x512xf32, #tpu.memory_space<vmem>>, vector<1x4x32xf32>,
    %106 = vector.extract_strided_slice %40 {offsets = [0, 64], sizes = [4, 16], strides = [1, 1]} : vector<16x128xf32> to vector<4x16xf32>
    %107 = vector.extract_strided_slice %40 {offsets = [4, 64], sizes = [4, 16], strides = [1, 1]} : vector<16x128xf32> to vector<4x16xf32>
    %108 = tpu.concatenate %106, %107 in 1 : vector<4x16xf32>, vector<4x16xf32> -> vector<4x32xf32>
    %109 = arith.truncf %108 : vector<4x32xf32> to vector<4x32xbf16>
    %cst_53 = arith.constant dense<0.000000e+00> : vector<4x32xf32>
    %110 = tpu.matmul %109, %41, %cst_53 {dimension_numbers = #tpu.dot_dimension_numbers<[1], [0], [0], [1], [0, 0, 1, 1], [], []>} : vector<4x32xbf16>, vector<32x32xbf16>, vector<4x32xf32> -> vector<4x32xf32>
    %c0_54 = arith.constant 0 : index
    %c0_55 = arith.constant 0 : index
    %c256 = arith.constant 256 : index
    %111 = vector.load %arg8[%c0_54, %c0_55, %c256] : memref<1x4x512xf32, #tpu.memory_space<vmem>>, vector<1x4x32xf32>
    %112 = vector.shape_cast %111 : vector<1x4x32xf32> to vector<4x32xf32>
    %113 = vector.shape_cast %110 : vector<4x32xf32> to vector<1x4x32xf32>
    tpu.vector_store %arg8[%c0_54, %c0_55, %c256], %113 {strides = array<i32>} : memref<1x4x512xf32, #tpu.memory_space<vmem>>, vector<1x4x32xf32>,
    %114 = vector.extract_strided_slice %40 {offsets = [8, 64], sizes = [4, 16], strides = [1, 1]} : vector<16x128xf32> to vector<4x16xf32>
    %115 = vector.extract_strided_slice %40 {offsets = [12, 64], sizes = [4, 16], strides = [1, 1]} : vector<16x128xf32> to vector<4x16xf32>
    %116 = tpu.concatenate %114, %115 in 1 : vector<4x16xf32>, vector<4x16xf32> -> vector<4x32xf32>
    %117 = arith.truncf %116 : vector<4x32xf32> to vector<4x32xbf16>
    %cst_56 = arith.constant dense<0.000000e+00> : vector<4x32xf32>
    %118 = tpu.matmul %117, %41, %cst_56 {dimension_numbers = #tpu.dot_dimension_numbers<[1], [0], [0], [1], [0, 0, 1, 1], [], []>} : vector<4x32xbf16>, vector<32x32xbf16>, vector<4x32xf32> -> vector<4x32xf32>
    %c0_57 = arith.constant 0 : index
    %c0_58 = arith.constant 0 : index
    %c288 = arith.constant 288 : index
    %119 = vector.load %arg8[%c0_57, %c0_58, %c288] : memref<1x4x512xf32, #tpu.memory_space<vmem>>, vector<1x4x32xf32>
    %120 = vector.shape_cast %119 : vector<1x4x32xf32> to vector<4x32xf32>
    %121 = vector.shape_cast %118 : vector<4x32xf32> to vector<1x4x32xf32>
    tpu.vector_store %arg8[%c0_57, %c0_58, %c288], %121 {strides = array<i32>} : memref<1x4x512xf32, #tpu.memory_space<vmem>>, vector<1x4x32xf32>,
    %122 = vector.extract_strided_slice %40 {offsets = [0, 80], sizes = [4, 16], strides = [1, 1]} : vector<16x128xf32> to vector<4x16xf32>
    %123 = vector.extract_strided_slice %40 {offsets = [4, 80], sizes = [4, 16], strides = [1, 1]} : vector<16x128xf32> to vector<4x16xf32>
    %124 = tpu.concatenate %122, %123 in 1 : vector<4x16xf32>, vector<4x16xf32> -> vector<4x32xf32>
    %125 = arith.truncf %124 : vector<4x32xf32> to vector<4x32xbf16>
    %cst_59 = arith.constant dense<0.000000e+00> : vector<4x32xf32>
    %126 = tpu.matmul %125, %41, %cst_59 {dimension_numbers = #tpu.dot_dimension_numbers<[1], [0], [0], [1], [0, 0, 1, 1], [], []>} : vector<4x32xbf16>, vector<32x32xbf16>, vector<4x32xf32> -> vector<4x32xf32>
    %c0_60 = arith.constant 0 : index
    %c0_61 = arith.constant 0 : index
    %c320 = arith.constant 320 : index
    %127 = vector.load %arg8[%c0_60, %c0_61, %c320] : memref<1x4x512xf32, #tpu.memory_space<vmem>>, vector<1x4x32xf32>
    %128 = vector.shape_cast %127 : vector<1x4x32xf32> to vector<4x32xf32>
    %129 = vector.shape_cast %126 : vector<4x32xf32> to vector<1x4x32xf32>
    tpu.vector_store %arg8[%c0_60, %c0_61, %c320], %129 {strides = array<i32>} : memref<1x4x512xf32, #tpu.memory_space<vmem>>, vector<1x4x32xf32>,
    %130 = vector.extract_strided_slice %40 {offsets = [8, 80], sizes = [4, 16], strides = [1, 1]} : vector<16x128xf32> to vector<4x16xf32>
    %131 = vector.extract_strided_slice %40 {offsets = [12, 80], sizes = [4, 16], strides = [1, 1]} : vector<16x128xf32> to vector<4x16xf32>
    %132 = tpu.concatenate %130, %131 in 1 : vector<4x16xf32>, vector<4x16xf32> -> vector<4x32xf32>
    %133 = arith.truncf %132 : vector<4x32xf32> to vector<4x32xbf16>
    %cst_62 = arith.constant dense<0.000000e+00> : vector<4x32xf32>
    %134 = tpu.matmul %133, %41, %cst_62 {dimension_numbers = #tpu.dot_dimension_numbers<[1], [0], [0], [1], [0, 0, 1, 1], [], []>} : vector<4x32xbf16>, vector<32x32xbf16>, vector<4x32xf32> -> vector<4x32xf32>
    %c0_63 = arith.constant 0 : index
    %c0_64 = arith.constant 0 : index
    %c352 = arith.constant 352 : index
    %135 = vector.load %arg8[%c0_63, %c0_64, %c352] : memref<1x4x512xf32, #tpu.memory_space<vmem>>, vector<1x4x32xf32>
    %136 = vector.shape_cast %135 : vector<1x4x32xf32> to vector<4x32xf32>
    %137 = vector.shape_cast %134 : vector<4x32xf32> to vector<1x4x32xf32>
    tpu.vector_store %arg8[%c0_63, %c0_64, %c352], %137 {strides = array<i32>} : memref<1x4x512xf32, #tpu.memory_space<vmem>>, vector<1x4x32xf32>,
    %138 = vector.extract_strided_slice %40 {offsets = [0, 96], sizes = [4, 16], strides = [1, 1]} : vector<16x128xf32> to vector<4x16xf32>
    %139 = vector.extract_strided_slice %40 {offsets = [4, 96], sizes = [4, 16], strides = [1, 1]} : vector<16x128xf32> to vector<4x16xf32>
    %140 = tpu.concatenate %138, %139 in 1 : vector<4x16xf32>, vector<4x16xf32> -> vector<4x32xf32>
    %141 = arith.truncf %140 : vector<4x32xf32> to vector<4x32xbf16>
    %cst_65 = arith.constant dense<0.000000e+00> : vector<4x32xf32>
    %142 = tpu.matmul %141, %41, %cst_65 {dimension_numbers = #tpu.dot_dimension_numbers<[1], [0], [0], [1], [0, 0, 1, 1], [], []>} : vector<4x32xbf16>, vector<32x32xbf16>, vector<4x32xf32> -> vector<4x32xf32>
    %c0_66 = arith.constant 0 : index
    %c0_67 = arith.constant 0 : index
    %c384 = arith.constant 384 : index
    %143 = vector.load %arg8[%c0_66, %c0_67, %c384] : memref<1x4x512xf32, #tpu.memory_space<vmem>>, vector<1x4x32xf32>
    %144 = vector.shape_cast %143 : vector<1x4x32xf32> to vector<4x32xf32>
    %145 = vector.shape_cast %142 : vector<4x32xf32> to vector<1x4x32xf32>
    tpu.vector_store %arg8[%c0_66, %c0_67, %c384], %145 {strides = array<i32>} : memref<1x4x512xf32, #tpu.memory_space<vmem>>, vector<1x4x32xf32>,
    %146 = vector.extract_strided_slice %40 {offsets = [8, 96], sizes = [4, 16], strides = [1, 1]} : vector<16x128xf32> to vector<4x16xf32>
    %147 = vector.extract_strided_slice %40 {offsets = [12, 96], sizes = [4, 16], strides = [1, 1]} : vector<16x128xf32> to vector<4x16xf32>
    %148 = tpu.concatenate %146, %147 in 1 : vector<4x16xf32>, vector<4x16xf32> -> vector<4x32xf32>
    %149 = arith.truncf %148 : vector<4x32xf32> to vector<4x32xbf16>
    %cst_68 = arith.constant dense<0.000000e+00> : vector<4x32xf32>
    %150 = tpu.matmul %149, %41, %cst_68 {dimension_numbers = #tpu.dot_dimension_numbers<[1], [0], [0], [1], [0, 0, 1, 1], [], []>} : vector<4x32xbf16>, vector<32x32xbf16>, vector<4x32xf32> -> vector<4x32xf32>
    %c0_69 = arith.constant 0 : index
    %c0_70 = arith.constant 0 : index
    %c416 = arith.constant 416 : index
    %151 = vector.load %arg8[%c0_69, %c0_70, %c416] : memref<1x4x512xf32, #tpu.memory_space<vmem>>, vector<1x4x32xf32>
    %152 = vector.shape_cast %151 : vector<1x4x32xf32> to vector<4x32xf32>
    %153 = vector.shape_cast %150 : vector<4x32xf32> to vector<1x4x32xf32>
    tpu.vector_store %arg8[%c0_69, %c0_70, %c416], %153 {strides = array<i32>} : memref<1x4x512xf32, #tpu.memory_space<vmem>>, vector<1x4x32xf32>,
    %154 = vector.extract_strided_slice %40 {offsets = [0, 112], sizes = [4, 16], strides = [1, 1]} : vector<16x128xf32> to vector<4x16xf32>
    %155 = vector.extract_strided_slice %40 {offsets = [4, 112], sizes = [4, 16], strides = [1, 1]} : vector<16x128xf32> to vector<4x16xf32>
    %156 = tpu.concatenate %154, %155 in 1 : vector<4x16xf32>, vector<4x16xf32> -> vector<4x32xf32>
    %157 = arith.truncf %156 : vector<4x32xf32> to vector<4x32xbf16>
    %cst_71 = arith.constant dense<0.000000e+00> : vector<4x32xf32>
    %158 = tpu.matmul %157, %41, %cst_71 {dimension_numbers = #tpu.dot_dimension_numbers<[1], [0], [0], [1], [0, 0, 1, 1], [], []>} : vector<4x32xbf16>, vector<32x32xbf16>, vector<4x32xf32> -> vector<4x32xf32>
    %c0_72 = arith.constant 0 : index
    %c0_73 = arith.constant 0 : index
    %c448 = arith.constant 448 : index
    %159 = vector.load %arg8[%c0_72, %c0_73, %c448] : memref<1x4x512xf32, #tpu.memory_space<vmem>>, vector<1x4x32xf32>
    %160 = vector.shape_cast %159 : vector<1x4x32xf32> to vector<4x32xf32>
    %161 = vector.shape_cast %158 : vector<4x32xf32> to vector<1x4x32xf32>
    tpu.vector_store %arg8[%c0_72, %c0_73, %c448], %161 {strides = array<i32>} : memref<1x4x512xf32, #tpu.memory_space<vmem>>, vector<1x4x32xf32>,
    %162 = vector.extract_strided_slice %40 {offsets = [8, 112], sizes = [4, 16], strides = [1, 1]} : vector<16x128xf32> to vector<4x16xf32>
    %163 = vector.extract_strided_slice %40 {offsets = [12, 112], sizes = [4, 16], strides = [1, 1]} : vector<16x128xf32> to vector<4x16xf32>
    %164 = tpu.concatenate %162, %163 in 1 : vector<4x16xf32>, vector<4x16xf32> -> vector<4x32xf32>
    %165 = arith.truncf %164 : vector<4x32xf32> to vector<4x32xbf16>
    %cst_74 = arith.constant dense<0.000000e+00> : vector<4x32xf32>
    %166 = tpu.matmul %165, %41, %cst_74 {dimension_numbers = #tpu.dot_dimension_numbers<[1], [0], [0], [1], [0, 0, 1, 1], [], []>} : vector<4x32xbf16>, vector<32x32xbf16>, vector<4x32xf32> -> vector<4x32xf32>
    %c0_75 = arith.constant 0 : index
    %c0_76 = arith.constant 0 : index
    %c480 = arith.constant 480 : index
    %167 = vector.load %arg8[%c0_75, %c0_76, %c480] : memref<1x4x512xf32, #tpu.memory_space<vmem>>, vector<1x4x32xf32>
    %168 = vector.shape_cast %167 : vector<1x4x32xf32> to vector<4x32xf32>
    %169 = vector.shape_cast %166 : vector<4x32xf32> to vector<1x4x32xf32>
    tpu.vector_store %arg8[%c0_75, %c0_76, %c480], %169 {strides = array<i32>} : memref<1x4x512xf32, #tpu.memory_space<vmem>>, vector<1x4x32xf32>,
    return
  }
  func.func @transform_0(%arg0: i32, %arg1: i32) -> (i32, i32, i32) {
    %c1_i32 = arith.constant 1 : i32
    %0 = arith.muli %arg1, %c1_i32 : i32
    %c1_i32_0 = arith.constant 1 : i32
    %1 = arith.subi %0, %c1_i32_0 : i32
    %c0_i32 = arith.constant 0 : i32
    %2 = arith.maxsi %1, %c0_i32 : i32
    %c0_i32_1 = arith.constant 0 : i32
    %c0_i32_2 = arith.constant 0 : i32
    return %arg0, %c0_i32_1, %2 : i32, i32, i32
  }
  func.func @transform_1(%arg0: i32, %arg1: i32) -> (i32, i32, i32) {
    %c0_i32 = arith.constant 0 : i32
    %c0_i32_0 = arith.constant 0 : i32
    return %arg0, %c0_i32, %arg1 : i32, i32, i32
  }
  func.func @transform_2(%arg0: i32, %arg1: i32) -> (i32, i32, i32) {
    %c1_i32 = arith.constant 1 : i32
    %0 = arith.addi %arg1, %c1_i32 : i32
    %c1_i32_0 = arith.constant 1 : i32
    %1 = arith.muli %0, %c1_i32_0 : i32
    %c1_i32_1 = arith.constant 1 : i32
    %2 = arith.minsi %1, %c1_i32_1 : i32
    %c0_i32 = arith.constant 0 : i32
    %c0_i32_2 = arith.constant 0 : i32
    return %arg0, %c0_i32, %2 : i32, i32, i32
  }
  func.func @transform_3(%arg0: i32, %arg1: i32) -> (i32, i32) {
    %c0_i32 = arith.constant 0 : i32
    %c0_i32_0 = arith.constant 0 : i32
    %c0_i32_1 = arith.constant 0 : i32
    return %c0_i32, %c0_i32_0 : i32, i32
  }
  func.func @transform_4(%arg0: i32, %arg1: i32) -> (i32, i32) {
    %c0_i32 = arith.constant 0 : i32
    %c0_i32_0 = arith.constant 0 : i32
    %c0_i32_1 = arith.constant 0 : i32
    return %c0_i32, %c0_i32_0 : i32, i32
  }
  func.func @transform_5(%arg0: i32, %arg1: i32) -> (i32, i32) {
    %c0_i32 = arith.constant 0 : i32
    %c0_i32_0 = arith.constant 0 : i32
    %c0_i32_1 = arith.constant 0 : i32
    return %c0_i32, %c0_i32_0 : i32, i32
  }
  func.func @transform_6(%arg0: i32, %arg1: i32) -> (i32, i32, i32) {
    %c0_i32 = arith.constant 0 : i32
    %c0_i32_0 = arith.constant 0 : i32
    return %arg0, %c0_i32, %arg1 : i32, i32, i32
  }
}

</mosaic_0001>

<bundles_post_ra>
// kernel: tpu_custom_call.1
= control target key start
LH: loop header
LB: loop body
LE: loop exit
PB: predicated region body
PF: predicated region fallthrough
CT: control target
= control target key end

     0   :  { %s3313_s0 = inlined_call_operand.hbm [shape: bf16[2,4,256], index: 0, kind: input, shape index: {}]   ;;  %s3314_s1 = inlined_call_operand.hbm [shape: bf16[2,4,256], index: 1, kind: input, shape index: {}]   ;;  %s3315_s2 = inlined_call_operand.hbm [shape: bf16[2,4,256], index: 2, kind: input, shape index: {}]   ;;  %s3316_s3 = inlined_call_operand.hbm [shape: bf16[16,37], index: 3, kind: input, shape index: {}]   ;;  %s3317_s4 = inlined_call_operand.vmem [shape: bf16[3,128], index: 4, kind: input, shape index: {}]   ;;  %s3318_s5 = inlined_call_operand.vmem [shape: bf16[32,32], index: 5, kind: input, shape index: {}]   ;;  %s3319_s6 = inlined_call_operand.hbm [shape: f32[2,4,1024], index: 6, kind: output, shape index: {}]  }
   0x1   :  { %3338 = sst [smem:[#allocation25_spill]] %s3314_s1 }
   0x2   :  { %3339 = sst [smem:[#allocation26_spill]] %s3316_s3 }
   0x3   :  { %3340 = sst [smem:[#allocation27_spill]] %s3317_s4 }
   0x4   :  { %3341 = sst [smem:[#allocation28_spill]] %s3318_s5 }
   0x5   :  { %3342 = sst [smem:[#allocation29_spill]] %s3319_s6 }
   0x6   :  { %11 = vsyncpa [#allocation4], 0 }
   0x7   :  { %13 = vsyncpa [#allocation4 + $0x1], 0 }
   0x8   :  { %14 = vsyncpa [#allocation7], 0 }
   0x9   :  { %16 = vsyncpa [#allocation7 + $0x1], 0 }
   0xa   :  { %17 = vsyncpa [#allocation10], 0 }
   0xb   :  { %18 = vsyncpa [#allocation5], 0 }
   0xc   :  { %20 = vsyncpa [#allocation5 + $0x1], 0  ;;  %s2602_s21 = smov 0   ;;  %s2604_s22 = smov 0  }
   0xd   :  { %s2606_s23 = smov 0   ;;  %s2608_s24 = smov 0  }
   0xe   :  { %s2610_s25 = smov 0   ;;  %s2612_s26 = smov 0  }
   0xf   :  { %s2614_s27 = smov 0   ;;  %s2616_s28 = smov 0  }
  0x10   :  { %s2618_s29 = smov 0   ;;  %s2620_s30 = smov 0  }
  0x11   :  { %s2622_s7 = smov 0   ;;  %s2624_s8 = smov 0  }
  0x12   :  { %s2626_s9 = smov 0   ;;  %s2628_s10 = smov 0  }
  0x13 LB: > { %3343 = sst [smem:[#allocation17_spill]] %s2493_s24  ;;  %s2673_s11 = sadd.s32 4294967295, %s2533_s10   ;;  %s2533_s10 = sphi %s2628_s10, %s26_s10   ;;  %s2529_s9 = sphi %s2626_s9, %s3411_s9   ;;  %s2525_s8 = sphi %s2624_s8, %s3410_s8   ;;  %s2521_s7 = sphi %s2622_s7, %s3409_s7   ;;  %s2517_s30 = sphi %s2620_s30, %s3408_s30   ;;  %s2513_s29 = sphi %s2618_s29, %s3407_s29   ;;  %s2509_s28 = sphi %s2616_s28, %s3406_s28   ;;  %s2505_s27 = sphi %s2614_s27, %s3405_s27   ;;  %s2501_s26 = sphi %s2612_s26, %s3404_s26   ;;  %s2497_s25 = sphi %s2610_s25, %s3403_s25   ;;  %s2493_s24 = sphi %s2608_s24, %s3402_s24   ;;  %s2489_s23 = sphi %s2606_s23, %s3401_s23   ;;  %s2485_s22 = sphi %s2604_s22, %s3400_s22   ;;  %s2481_s21 = sphi %s2602_s21, %s3399_s21  }
  0x14   : > { %3344 = sst [smem:[#allocation18_spill]] %s2517_s30  ;;  %s1768_s12 = sadd.s32 4294967294, %s2533_s10  }
  0x15   : > { %3345 = sst [smem:[#allocation19_spill]] %s2521_s7  ;;  %s35_s13 = sadd.s32 1, %s2525_s8 }
  0x16   : > { %s38_s14 = sadd.s32 1, %s2529_s9  ;;  %p36_p0 = scmp.ge.s32.totalorder %s35_s13, 2 }
  0x17   : > { %p3329_p1 = scmp.eq.s32.totalorder %s2533_s10, 0  ;;  %p3330_p2 = scmp.eq.s32.totalorder %s2673_s11, 0 }
  0x18   : > { %s3413_s13 = smov (%p36_p0, %s35_s13), 0  ;;  %s3415_s14 = smov (!%p36_p0, %s38_s14), %s2529_s9 }
  0x19   : > { %3346 = sst [smem:[#allocation20_spill]] %s3413_s13  ;;  %p88_p3 = scmp.ne.s32.totalorder %s2501_s26, %s2497_s25 }
  0x1a   : > { %p94_p4 = scmp.ne.s32.totalorder %s2497_s25, %s2493_s24  ;;  %p217_p5 = scmp.eq.s32.totalorder %s2673_s11, 3 }
  0x1b   : > { %p2695_p6 = por %p88_p3, %p3329_p1  ;;  %p223_p7 = scmp.eq.s32.totalorder %s1768_s12, 3 }
  0x1c   : > { %p2701_p8 = por %p94_p4, %p3330_p2  ;;  %p2705_p9 = por %p217_p5, %p88_p3 }
  0x1d   : > { %p2709_p10 = por %p223_p7, %p94_p4  ;;  %p3328_p11 = scmp.lt.s32.totalorder %s2533_s10, 4 }
  0x1e   : > { %s3348_s18 = scalar_select %p2701_p8, 1, 0 }
  0x1f   : > { %s3350_s19 = scalar_select %p2705_p9, 1, 0 }
  0x20   : > { %3349 = sst [smem:[#allocation21_spill]] %s3348_s18  ;;  %s1776_s15 = sshll.u32 %s2529_s9, 1 }
  0x21   : > { %3351 = sst [smem:[#allocation22_spill]] %s3350_s19  ;;  %s285_s16 = sand.u32 1, %s2533_s10  }
  0x22   : > { %s3352_s20 = scalar_select %p2709_p10, 1, 0 }
  0x23   : > { %s287_s24 = sand.u32 1, %s2501_s26   ;;  %s294_s7 = sadd.s32 %s2525_s8, %s1776_s15 }
  0x24   : > { %3353 = sst [smem:[#allocation23_spill]] %s3352_s20  ;;  %s1778_s6 = sshll.u32 %s287_s24, 1 }
  0x25   : > { %s1780_s12 = sshll.u32 %s294_s7, 5  ;;  %s3354_s1 = sld [smem:[#allocation25_spill]] }
  0x26   : > { %s289_s19 = scalar_lea.vmem [#allocation6], %s1778_s6  ;;  %p2729_p12 = pnand %p3328_p11, %p2695_p6 }
  0x27   : > { %s298_s18 = sshll.u32 %s289_s19, 4  ;;  %s2733_s24 = scalar_lea.sflag [#allocation7], %s285_s16  ;;  %s2723_s18 = int_to_ptr.vmem [resolvable:$true] %s298_s18 }
  0x28   : > { %p2255_p0 = pneg %p2729_p12 }
  0x2b   : > { %s2721_s30 = scalar_lea.hbm %s3354_s1, %s1780_s12  ;;  %s2258_s7 = scalar_lea.hbm %s3354_s1, 128 }
  0x2c   : > { %s2253_s4 = scalar_lea.hbm %s2721_s30, 32  ;;  %p2259_p5 = scmp.lt.u32.totalorder %s2721_s30, %s3354_s1 }
  0x2d   : > { %p2254_p13 = scmp.ne.s32.totalorder %s2721_s30, %s2253_s4  ;;  %p2260_p6 = scmp.lt.u32.totalorder %s2258_s7, %s2253_s4 }
  0x2e   : > { %p2262_p11 = scmp.lt.u32.totalorder %s2253_s4, %s2721_s30 }
  0x2f   : > { %p2256_p3 = pnand %p2255_p0, %p2254_p13  ;;  %p2261_p7 = por %p2260_p6, %p2259_p5 }
  0x31   : > { %p2257_p4 = pneg %p2256_p3  ;;  %p2263_p1 = por %p2262_p11, %p2261_p7 }
  0x33   : > { %p2264_p2 = pnand %p2263_p1, %p2257_p4 }
  0x35   : > { %2267 = shalt.err (!%p2264_p2)
}
  0x36   : > { %s2268_s16 = scalar_lea.vmem %s2723_s18, 32  ;;  %s2535_s19 = smov [#allocation6]  }
  0x37   : > { %p2269_p13 = scmp.ne.s32.totalorder %s2723_s18, %s2268_s16  ;;  %s2273_s12 = sshll.u32 %s2535_s19, 4  ;;  %s2274_s12 = int_to_ptr.vmem [resolvable:$false] %s2273_s12 }
  0x38   : > { %s2275_s5 = scalar_lea.vmem %s2274_s12, 64  ;;  %p2276_p9 = scmp.lt.s32.totalorder %s2723_s18, %s2274_s12 }
  0x39   : > { %p2271_p3 = pnand %p2269_p13, %p2255_p0  ;;  %p2277_p5 = scmp.lt.s32.totalorder %s2275_s5, %s2268_s16 }
  0x3b   : > { %p2272_p10 = pneg %p2271_p3  ;;  %p2278_p6 = por %p2277_p5, %p2276_p9 }
  0x3d   : > { %p2279_p11 = pnand %p2278_p6, %p2272_p10 }
  0x3f   : > { %2282 = shalt.err (!%p2279_p11)
}
  0x40   : > { %2032 = dma.hbm_to_vmem [thread:$0]  (!%p2729_p12), %s2721_s30, 32, %s2723_s18, %s2733_s24  }
  0x41   : > { %p1771_p1 = scmp.ge.s32.totalorder %s2533_s10, 1  ;;  %p230_p2 = scmp.lt.s32.totalorder %s2533_s10, 5 }
  0x42   : > { %s2536_s4 = smov [#allocation9]   ;;  %p3357_p10 = scmp.eq.s32.totalorder %s2673_s11, 0 }
  0x43   : > { %s242_s6 = sshll.u32 %s2536_s4, 4  ;;  %p2763_p0 = pnand %p1771_p1, %p230_p2  ;;  %s243_s6 = int_to_ptr.vmem [resolvable:$true] %s242_s6 }
  0x44   : > { %s3359_s3 = sld [smem:[#allocation26_spill]] }
  0x45   : > { %s3356_s7 = scalar_select %p2763_p0, 1, 0 }
  0x46   : > { %p2022_p9 = pneg %p2763_p0 }
  0x48   : > { %p2771_p4 = pnand %p2022_p9, %p3357_p10 }
  0x4a   : > { %s2283_s15 = scalar_lea.hbm %s3359_s3, 128  ;;  %p2285_p13 = pneg %p2771_p4 }
  0x4b   : > { %p2284_p12 = scmp.ne.s32.totalorder %s3359_s3, %s2283_s15  ;;  %p2290_p6 = scmp.lt.u32.totalorder %s2283_s15, %s3359_s3 }
  0x4d   : > { %p2286_p3 = pnand %p2285_p13, %p2284_p12 }
  0x4f   : > { %p2287_p5 = pneg %p2286_p3 }
  0x51   : > { %p2292_p11 = pnand %p2290_p6, %p2287_p5 }
  0x53   : > { %2295 = shalt.err (!%p2292_p11)
}
  0x54   : > { %s2296_s5 = scalar_lea.vmem %s243_s6, 128  ;;  %p2304_p10 = scmp.lt.s32.totalorder %s243_s6, %s243_s6 }
  0x55   : > { %p2297_p1 = scmp.ne.s32.totalorder %s243_s6, %s2296_s5  ;;  %p2305_p7 = scmp.lt.s32.totalorder %s2296_s5, %s2296_s5 }
  0x57   : > { %p2299_p2 = pnand %p2297_p1, %p2285_p13  ;;  %p2306_p8 = por %p2305_p7, %p2304_p10 }
  0x59   : > { %p2300_p9 = pneg %p2299_p2 }
  0x5b   : > { %p2307_p0 = pnand %p2306_p8, %p2300_p9 }
  0x5d   : > { %2310 = shalt.err (!%p2307_p0)
}
  0x5e   : > { %s2537_s4 = smov 64   ;;  %s2538_s30 = smov 4  }
  0x5f   : > { %2025 = dma.hbm_to_vmem [thread:$0]  (!%p2771_p4), %s3359_s3, 128, %s243_s6, [#allocation10], %s2537_s4, %s2537_s4, %s2538_s30  }
  0x60   : > { %p3360_p8 = scmp.ge.s32.totalorder %s3415_s14, 2  ;;  %s53_s16 = sadd.s32 1, %s2513_s29 }
  0x61   : > { %p60_p0 = scmp.ne.s32.totalorder %s2513_s29, %s2509_s28  ;;  %p66_p7 = scmp.ne.s32.totalorder %s2509_s28, %s2505_s27 }
  0x62   : > { %s3417_s14 = smov (%p3360_p8, %s3415_s14), 0  ;;  %p3362_p12 = scmp.eq.s32.totalorder %s2533_s10, 0 }
  0x63   : > { %3361 = sst [smem:[#allocation24_spill]] %s3417_s14  ;;  %s2799_s17 = ssub.s32 %s2529_s9, %s3417_s14 }
  0x64   : > { %p2808_p13 = por %p3362_p12, %p60_p0  ;;  %p3336_p4 = scmp.eq.s32.totalorder %s2799_s17, 0 }
  0x65   : > { %p3364_p3 = scmp.eq.s32.totalorder %s2673_s11, 0  ;;  %s3366_s19 = ssub.s32 %s2525_s8, %s3413_s13 }
  0x66   : > { %s78_s12 = sor.u32 %s3366_s19, %s2799_s17  ;;  %s262_s5 = sand.u32 1, %s2513_s29  }
  0x67   : > { %p2815_p5 = por %p3364_p3, %p66_p7  ;;  %p79_p6 = scmp.eq.s32.totalorder %s78_s12, 0 }
  0x68   : > { %s2827_s4 = scalar_select %p3336_p4, %s2513_s29, %s53_s16  }
  0x69   : > { %s1774_s27 = sshll.u32 %s262_s5, 1  ;;  %s3367_s30 = sadd.s32 1, %s2501_s26 }
  0x6a   : > { %s2832_s18 = scalar_select %p79_p6, %s2501_s26, %s3367_s30  }
  0x6b   : > { %s2475_s15 = sshll.u32 %s2529_s9, 6  ;;  %s266_s19 = scalar_lea.vmem [#allocation3], %s1774_s27 }
  0x6c   : > { %s2840_s14 = scalar_lea.hbm %s3313_s0, %s2475_s15  ;;  %s278_s13 = sshll.u32 %s266_s19, 4  ;;  %s2842_s13 = int_to_ptr.vmem [resolvable:$true] %s278_s13 }
  0x6d   : > { %p3368_p11 = scmp.lt.s32.totalorder %s2533_s10, 4  ;;  %s263_s12 = scalar_lea.sflag [#allocation4], %s262_s5 }
  0x6e   : > { %s2311_s1 = scalar_lea.hbm %s2840_s14, 32  ;;  %s2316_s20 = scalar_lea.hbm %s3313_s0, 128 }
  0x6f   : > { %p2848_p1 = pnand %p3368_p11, %p2808_p13  ;;  %p2312_p2 = scmp.ne.s32.totalorder %s2840_s14, %s2311_s1 }
  0x70   : > { %p2317_p0 = scmp.lt.u32.totalorder %s2840_s14, %s3313_s0  ;;  %p2318_p7 = scmp.lt.u32.totalorder %s2316_s20, %s2311_s1 }
  0x71   : > { %p2313_p9 = pneg %p2848_p1  ;;  %p2320_p13 = scmp.lt.u32.totalorder %s2311_s1, %s2840_s14 }
  0x72   : > { %p2319_p12 = por %p2318_p7, %p2317_p0 }
  0x73   : > { %p2314_p10 = pnand %p2313_p9, %p2312_p2 }
  0x74   : > { %p2321_p3 = por %p2320_p13, %p2319_p12 }
  0x75   : > { %p2315_p8 = pneg %p2314_p10 }
  0x77   : > { %p2322_p6 = pnand %p2321_p3, %p2315_p8 }
  0x79   : > { %2325 = shalt.err (!%p2322_p6)
}
  0x7a   : > { %s2326_s5 = scalar_lea.vmem %s2842_s13, 32  ;;  %s2539_s3 = smov [#allocation3]  }
  0x7b   : > { %p2327_p11 = scmp.ne.s32.totalorder %s2842_s13, %s2326_s5  ;;  %s2331_s27 = sshll.u32 %s2539_s3, 4  ;;  %s2332_s27 = int_to_ptr.vmem [resolvable:$false] %s2331_s27 }
  0x7c   : > { %s2333_s30 = scalar_lea.vmem %s2332_s27, 64  ;;  %p2334_p4 = scmp.lt.s32.totalorder %s2842_s13, %s2332_s27 }
  0x7d   : > { %p2329_p2 = pnand %p2327_p11, %p2313_p9  ;;  %p2335_p0 = scmp.lt.s32.totalorder %s2333_s30, %s2326_s5 }
  0x7f   : > { %p2330_p10 = pneg %p2329_p2  ;;  %p2336_p7 = por %p2335_p0, %p2334_p4 }
  0x81   : > { %p2337_p12 = pnand %p2336_p7, %p2330_p10 }
  0x83   : > { %2340 = shalt.err (!%p2337_p12)
}
  0x84   : > { %2029 = dma.hbm_to_vmem [thread:$0]  (!%p2848_p1), %s2840_s14, 32, %s2842_s13, %s263_s12  }
  0x85   : > { %s115_s1 = sadd.s32 1, %s2489_s23  ;;  %p122_p4 = scmp.ne.s32.totalorder %s2489_s23, %s2485_s22 }
  0x86   : > { %p128_p9 = scmp.ne.s32.totalorder %s2485_s22, %s2481_s21  ;;  %s307_s20 = sand.u32 1, %s2489_s23  }
  0x87   : > { %p3370_p8 = scmp.eq.s32.totalorder %s2533_s10, 0  ;;  %p3371_p3 = scmp.eq.s32.totalorder %s2673_s11, 0 }
  0x88   : > { %s1781_s19 = sshll.u32 %s307_s20, 1  ;;  %s2477_s5 = sadd.s32 32, %s2475_s15 }
  0x89   : > { %p124_p13 = por %p122_p4, %p3370_p8  ;;  %p2887_p6 = por %p128_p9, %p3371_p3 }
  0x8a   : > { %s309_s3 = scalar_lea.vmem [#allocation8], %s1781_s19  ;;  %p3373_p11 = scmp.eq.s32.totalorder %s2799_s17, 0 }
  0x8b   : > { %s3372_s16 = scalar_select %p2887_p6, 1, 0 }
  0x8c   : > { %s321_s27 = sshll.u32 %s309_s3, 4  ;;  %s2901_s21 = scalar_lea.hbm %s3315_s2, %s2477_s5  ;;  %s2903_s27 = int_to_ptr.vmem [resolvable:$true] %s321_s27 }
  0x8d   : > { %s2896_s30 = scalar_select %p3373_p11, %s2489_s23, %s115_s1  }
  0x8e   : > { %p3374_p1 = scmp.lt.s32.totalorder %s2533_s10, 4  ;;  %s2341_s17 = scalar_lea.hbm %s2901_s21, 32 }
  0x8f   : > { %p2342_p10 = scmp.ne.s32.totalorder %s2901_s21, %s2341_s17  ;;  %s2346_s20 = scalar_lea.hbm %s3315_s2, 128 }
  0x90   : > { %p2907_p2 = pnand %p3374_p1, %p124_p13  ;;  %p2347_p4 = scmp.lt.u32.totalorder %s2901_s21, %s3315_s2 }
  0x91   : > { %p2348_p9 = scmp.lt.u32.totalorder %s2346_s20, %s2341_s17  ;;  %p2350_p13 = scmp.lt.u32.totalorder %s2341_s17, %s2901_s21 }
  0x92   : > { %p2343_p0 = pneg %p2907_p2 }
  0x93   : > { %p2349_p8 = por %p2348_p9, %p2347_p4 }
  0x94   : > { %p2344_p7 = pnand %p2343_p0, %p2342_p10 }
  0x95   : > { %p2351_p3 = por %p2350_p13, %p2349_p8 }
  0x96   : > { %p2345_p12 = pneg %p2344_p7 }
  0x98   : > { %p2352_p11 = pnand %p2351_p3, %p2345_p12 }
  0x9a   : > { %2355 = shalt.err (!%p2352_p11)
}
  0x9b   : > { %s2356_s3 = scalar_lea.vmem %s2903_s27, 32  ;;  %s2540_s13 = smov [#allocation8]  }
  0x9c   : > { %p2357_p1 = scmp.ne.s32.totalorder %s2903_s27, %s2356_s3  ;;  %s2361_s14 = sshll.u32 %s2540_s13, 4  ;;  %s2362_s14 = int_to_ptr.vmem [resolvable:$false] %s2361_s14 }
  0x9d   : > { %s2363_s15 = scalar_lea.vmem %s2362_s14, 64  ;;  %p2364_p6 = scmp.lt.s32.totalorder %s2903_s27, %s2362_s14 }
  0x9e   : > { %p2359_p10 = pnand %p2357_p1, %p2343_p0  ;;  %p2365_p4 = scmp.lt.s32.totalorder %s2363_s15, %s2356_s3 }
  0xa0   : > { %p2360_p7 = pneg %p2359_p10  ;;  %p2366_p9 = por %p2365_p4, %p2364_p6 }
  0xa2   : > { %p2367_p8 = pnand %p2366_p9, %p2360_p7 }
  0xa4   : > { %2370 = shalt.err (!%p2367_p8)
}
  0xa5   : > { %2035 = dma.hbm_to_vmem [thread:$0]  (!%p2907_p2), %s2901_s21, 32, %s2903_s27, %s2733_s24  }
  0xa6   : > { %p3376_p12 = scmp.ne.s32.totalorder %s3356_s7, 0 }
  0xa7   : > { %s332_s17 = sand.u32 (!%p3376_p12), 1, %s2509_s28  }
  0xa8   : > { %330 = sbr.rel (%p3376_p12) target bundleno = 1596 (0x63c), region = 44  ;;  %s2940_s1 = sshll.u32 (!%p3376_p12), %s332_s17, 1 }
  0xa9   : > { %s333_s20 = scalar_lea.sflag (!%p3376_p12), [#allocation4], %s332_s17  ;;  %s336_s19 = scalar_lea.vmem (!%p3376_p12), [#allocation3], %s2940_s1 }
  0xaf   : > { %2456 = dma.done.wait (%p2815_p5), %s333_s20, 32  }
  0xb0   : > { %2458 = vsyncadd (%p2815_p5), %s333_s20, 4294967264  ;;  %s3377_s12 = sld [smem:[#allocation21_spill]]  ;;  %s341_s24 = sand.u32 1, %s2673_s11  }
  0xb1   : > { %s2949_s27 = sand.u32 1, %s2497_s25   ;;  %s342_s21 = scalar_lea.sflag [#allocation7], %s341_s24 }
  0xb2   : > { %s1786_s7 = sshll.u32 %s2949_s27, 1 }
  0xb3   : > { %s345_s5 = scalar_lea.vmem [#allocation6], %s1786_s7 }
  0xb6   : > { %p3378_p6 = scmp.ne.s32.totalorder %s3377_s12, 0 }
  0xb8   : > { %2460 = dma.done.wait (%p3378_p6), %s342_s21, 32  }
  0xb9   : > { %2462 = vsyncadd (%p3378_p6), %s342_s21, 4294967264  ;;  %s352_s3 = sand.u32 1, %s2485_s22   ;;  %p3379_p5 = scmp.ne.s32.totalorder %s3372_s16, 0 }
  0xba   : > { %s2957_s6 = sshll.u32 %s352_s3, 1 }
  0xbb   : > { %s354_s13 = scalar_lea.vmem [#allocation8], %s2957_s6 }
  0xbc   : > { %2464 = dma.done.wait (%p3379_p5), %s342_s21, 32  }
  0xbd   : > { %2466 = vsyncadd (%p3379_p5), %s342_s21, 4294967264  ;;  %p3380_p2 = scmp.eq.s32.totalorder %s2673_s11, 0 }
  0xbf   : > { %2468 = dma.done.wait (%p3380_p2), [#allocation10], 128   ;;  %p3381_p0 = pmov %p3380_p2 }
  0xc0   : > { %s1789_s14 = sshll.u32 %s2949_s27, 4  ;;  %v406_v0 = vld [vmem:[%s345_s5] sm:$0x3]  ;;  %s2541_s15 = smov 17   ;;  %vm414_vm0 = vcmask 1041544   ;;  %vm415_vm1 = vcmask 134146  }
  0xc1   : > { %2470 = vsyncadd (%p3381_p0), [#allocation10], 4294967168  ;;  %408 = vrot.lane.b32.xlu0 %v406_v0, %s2541_s15  ;;  %vm411_vm2 = vcmask 138240   ;;  %s2969_s16 = scalar_lea.vmem [#allocation11], %s1789_s14  ;;  %s3382_s17 = sld [smem:[#allocation18_spill]] }
  0xc2   : > { %vm416_vm3 = vmor %vm415_vm1, %vm414_vm0 }
  0xc7   : > { %p1790_p13 = scmp.ne.s32.totalorder %s3382_s17, 0 }
  0xc8   : > { %vm422_vm4 = vcmask (!%p1790_p13), 132096   ;;  %v2542_v4 = vmov (!%p1790_p13), 0  }
 0x131   : > { %421 = sbr.rel (%p1790_p13) target bundleno = 313 (0x139), region = 64 }
 0x133   : > { %v409_v1 = vpop.permute.xlu0 %408 }
 0x134   : > { %v410_v2 = vrot.slane %v409_v1, 6 }
 0x136   : > { %v412_v3 = vsel %vm411_vm2, %v410_v2, %v409_v1 }
 0x137   : > { %417 = vst.msk [vmem:[#allocation2] sm:$0xf] %vm416_vm3, %v412_v3 }
 0x138   : > { %423 = vst.msk [vmem:[#allocation2] sm:$0x3] %vm422_vm4, %v2542_v4 }
 0x139 PF: > { %s3383_s11 = sld [smem:[#allocation18_spill]] }
 0x13f   : > { %p1791_p3 = scmp.le.s32.totalorder %s3383_s11, 0 }
 0x140   : > { %v428_v5 = vld [vmem:[%s336_s19] sm:$0x3] (!%p1791_p3)  ;;  %s2543_s20 = smov (!%p1791_p3), 17   ;;  %vm433_vm5 = vcmask (!%p1791_p3), 132096  }
 0x141   : > { %427 = sbr.rel (%p1791_p3) target bundleno = 437 (0x1b5), region = 68  ;;  %430 = vrot.lane.b32.xlu0 (!%p1791_p3), %v428_v5, %s2543_s20 }
 0x1b3   : > { %v431_v6 = vpop.permute.xlu0 %430 }
 0x1b4   : > { %434 = vst.msk [vmem:[#allocation2] sm:$0x3] %vm433_vm5, %v431_v6 }
 0x1b5 PF: > { %s3384_s12 = sld [smem:[#allocation18_spill]] }
 0x1bb   : > { %p1792_p11 = scmp.ne.s32.totalorder %s3384_s12, 1 }
 0x1bc   : > { %vm439_vm6 = vcmask (!%p1792_p11), 271496   ;;  %v2544_v7 = vmov (!%p1792_p11), 0  }
 0x1bd   : > { %438 = sbr.rel (%p1792_p11) target bundleno = 452 (0x1c4), region = 72  ;;  %440 = vst.msk [vmem:[#allocation2 + $0x2] sm:$0x3] (!%p1792_p11), %vm439_vm6, %v2544_v7 }
 0x1c4 PF: > { %s3385_s24 = sld [smem:[#allocation18_spill]] }
 0x1ca   : > { %p1793_p1 = scmp.ge.s32.totalorder %s3385_s24, 1 }
 0x1cb   : > { %v445_v8 = vld [vmem:[%s354_s13] sm:$0x3] (!%p1793_p1)  ;;  %s2545_s1 = smov (!%p1793_p1), 17   ;;  %vm450_vm7 = vcmask (!%p1793_p1), 271496  }
 0x1cc   : > { %444 = sbr.rel (%p1793_p1) target bundleno = 576 (0x240), region = 76  ;;  %447 = vrot.lane.b32.xlu0 (!%p1793_p1), %v445_v8, %s2545_s1 }
 0x23e   : > { %v448_v9 = vpop.permute.xlu0 %447 }
 0x23f   : > { %451 = vst.msk [vmem:[#allocation2 + $0x2] sm:$0x3] %vm450_vm7, %v448_v9 }
 0x240 PF: > { %s3386_s21 = sld [smem:[#allocation27_spill]]  ;;  %v456_v11 = vlaneseq  ;;  %v2546_v12 = vmov 1983009808   ;;  %s2547_s5 = smov 16   ;;  %vm500_vm8 = vcmask 146432   ;;  %vm493_vm9 = vcmask 130048  }
 0x241   : > { %v469_v13 = vunpack.c.l.s4 %v2546_v12  ;;  %s2548_s3 = smov 18   ;;  %s2549_s6 = smov 2   ;;  %vm478_vm10 = vcmask 15360   ;;  %vm507_vm11 = vcmask 261120   ;;  %vm514_vm12 = vcmask 277504  }
 0x242   : > { %v457_v15 = vshrl.u32 %v456_v11, 7  ;;  %s2550_s13 = smov 32   ;;  %s2551_s14 = smov 34   ;;  %v2555_v53 = vmov 0.0   ;;  %vm2560_vm13 = vmmov 0   ;;  %vm532_vm14 = vcmask 1039360  }
 0x243   : > { %v470_v16 = vunpack.c.0.s8 %v469_v13  ;;  %s2552_s15 = smov 127   ;;  %s2553_s17 = smov 111   ;;  %1872 = vmatprep.subr.bf16.mxu0 %v2555_v53  ;;  %1882 = vmatprep.subr.bf16.mxu1 %v2555_v53  ;;  %v464_v8 = vld [vmem:[#allocation2] sm:$0x3]  ;;  %vm547_vm15 = vcmask 1031168   ;;  %vm632_vm0 = vcmask 1041408  }
 0x244   : > { %v458_v17 = vsub.s32 0, %v457_v15  ;;  %v462_v18 = vsub.s32 1, %v457_v15  ;;  %s2554_s11 = smov 126   ;;  %s2556_s20 = smov 96   ;;  %1878 = vmatprep.mubr.msk.bf16.mxu0 %vm2560_vm13, %v2555_v53  ;;  %1886 = vmatprep.mubr.msk.bf16.mxu1 %vm2560_vm13, %v2555_v53  ;;  %vm563_vm1 = vcmask 916480   ;;  %vm636_vm2 = vcmask 1043456  }
 0x245   : > { %v2982_v19 = vsub.s32 %v470_v16, %v457_v15  ;;  %s2557_s12 = smov 110   ;;  %s2558_s24 = smov 112   ;;  %vm639_vm3 = vcmask 1045504   ;;  %vm577_vm4 = vcmask 908288   ;;  %vm593_vm5 = vcmask 900096  }
 0x246   : > { %v452_v10 = vld [vmem:[%s3386_s21] sm:$0x3]  ;;  %v2986_v22 = vld [vmem:[#allocation2] sm:$0xf]  ;;  %s2559_s1 = smov 95   ;;  %s2561_s19 = smov 94  }
 0x247   : > { %v454_v14 = vpack.i.b16 %v452_v10, %v452_v10  ;;  %v519_v25 = vcombine.low %v2986_v22, %v2986_v22  ;;  %v571_v28 = vrot.slane %v2986_v22, %v2982_v19  ;;  %vm608_vm6 = vcmask 785408   ;;  %s1624_s7 = sshll.u32 %s2969_s16, 4  ;;  %s3235_s7 = int_to_ptr.vmem [resolvable:$true] %s1624_s7 }
 0x248   : > { %vm615_vm7 = vcmask 777216  }
 0x249   : > { %v2984_v20 = vrot.slane %v454_v14, %v458_v17  ;;  %v463_v21 = vrot.slane %v454_v14, %v462_v18  ;;  %v2996_v26 = vrot.slane %v519_v25, %v2982_v19  ;;  %v572_v29 = vcombine.high %v571_v28, %v571_v28 }
 0x24b   : > { %v489_v23 = vrot.slane %v2984_v20, %v2982_v19  ;;  %v474_v24 = vrot.slane %v463_v21, %v2982_v19  ;;  %v527_v27 = vcombine.high %v2996_v26, %v2996_v26  ;;  %v610_v62 = vcombine.low %v2996_v26, %v2996_v26 }
 0x24c   : > { %v465_v10 = vmul.bf16 %v464_v8, %v2984_v20 }
 0x24d   : > { %490 = vrot.lane.b32.xlu0 %v489_v23, %s2547_s5  ;;  %497 = vrot.lane.b32.xlu1 %v474_v24, %s2548_s3  ;;  %s3387_s3 = sld [smem:[#allocation28_spill]] }
 0x251   : > { %475 = vrot.lane.b32.xlu0 %v474_v24, %s2549_s6  ;;  %504 = vrot.lane.b32.xlu1 %v489_v23, %s2550_s13 }
 0x255   : > { %511 = vrot.lane.b32.xlu0 %v474_v24, %s2551_s14  ;;  %528 = vrot.lane.b32.xlu1 %v2996_v26, %s2552_s15  ;;  %s3391_s14 = sld [smem:[#allocation29_spill]] }
 0x259   : > { %530 = vrot.lane.b32.xlu0 %v527_v27, %s2552_s15  ;;  %573 = vrot.lane.b32.xlu1 %v571_v28, %s2553_s17  ;;  %v2562_v28 = vmov 65535   ;;  %s2563_s15 = smov 80  }
 0x25d   : > { %575 = vrot.lane.b32.xlu0 %v572_v29, %s2553_s17  ;;  %v666_v29 = vsel %vm632_vm0, 4294967295, %v2562_v28  ;;  %s2564_s17 = smov 64  }
 0x2bf   : > { %v491_v30 = vpop.permute.xlu0 %490  ;;  %v498_v31 = vpop.permute.xlu1 %497 }
 0x2c0   : > { %v499_v32 = vrot.slane %v498_v31, 6  ;;  %v492_v33 = vrot.slane %v491_v30, 6 }
 0x2c2   : > { %v501_v36 = vsel %vm500_vm8, %v499_v32, %v498_v31  ;;  %v494_v39 = vsel %vm493_vm9, %v492_v33, %v491_v30  ;;  %vm665_vm8 = vcmask 1042432  }
 0x2c3   : > { %v476_v34 = vpop.permute.xlu0 %475  ;;  %v505_v35 = vpop.permute.xlu1 %504  ;;  %v503_v42 = vmul.bf16 %v501_v36, %v2986_v22  ;;  %v496_v45 = vmul.bf16 %v494_v39, %v2986_v22  ;;  %v667_v32 = vsel %vm665_vm8, %v666_v29, 0  ;;  %v3051_v39 = vld [vmem:[%s3387_s3 + $0x8] sm:$0xff]  }
 0x2c4   : > { %v477_v37 = vrot.slane %v476_v34, 6  ;;  %v506_v38 = vrot.slane %v505_v35, 6 }
 0x2c5   : > { %v580_v48 = vcombine.low %v503_v42, %v503_v42  ;;  %v550_v52 = vcombine.low %v496_v45, %v496_v45 }
 0x2c6   : > { %v479_v40 = vsel %vm478_vm10, %v477_v37, %v476_v34  ;;  %v508_v41 = vsel %vm507_vm11, %v506_v38, %v505_v35  ;;  %vm630_vm10 = vcmask 769024   ;;  %v2250_v37 = vld [vmem:[#allocation9] sm:$0xff]  }
 0x2c7   : > { %v481_v43 = vmul.bf16 %v479_v40, %v2986_v22  ;;  %v510_v44 = vmul.bf16 %v508_v41, %v2986_v22  ;;  %v512_v47 = vpop.permute.xlu0 %511  ;;  %v587_v54 = vrot.slane %v580_v48, %v2982_v19  ;;  %v557_v56 = vrot.slane %v550_v52, %v2982_v19  ;;  %v529_v1 = vpop.permute.xlu1 %528  ;;  %v3045_v38 = vld [vmem:[%s3387_s3] sm:$0xff]  }
 0x2c8   : > { %v513_v51 = vrot.slane %v512_v47, 6  ;;  %1883 = vmatpush3.bf16.msra.mxu1 %v3045_v38 }
 0x2c9   : > { %v541_v46 = vrot.slane %v481_v43, %v2982_v19  ;;  %v602_v50 = vrot.slane %v510_v44, %v2982_v19  ;;  %v558_v60 = vcombine.low %v557_v56, %v557_v56  ;;  %v588_v61 = vcombine.high %v587_v54, %v587_v54  ;;  %1884 = vmatprep.subr.bf16.mxu1 %v2555_v53 }
 0x2ca   : > { %v515_v55 = vsel %vm514_vm12, %v513_v51, %v512_v47  ;;  %vm661_vm12 = vcmask 302080  }
 0x2cb   : > { %545 = vrot.lane.b32.xlu0 %v541_v46, %s2554_s11  ;;  %v542_v49 = vcombine.low %v541_v46, %v541_v46  ;;  %v603_v57 = vcombine.low %v602_v50, %v602_v50  ;;  %v517_v58 = vmul.bf16 %v515_v55, %v2986_v22  ;;  %v531_v0 = vpop.permute.xlu0 %530  ;;  %v574_v3 = vpop.permute.xlu1 %573 }
 0x2cc   : > { %v533_v12 = vsel %vm532_vm14, %v529_v1, %v531_v0  ;;  %1885 = vmatpush3.bf16.msra.mxu1 %v3051_v39  ;;  %vm779_vm14 = vcmask 257024  }
 0x2cd   : > { %543 = vrot.lane.b32.xlu1 %v542_v49, %s2554_s11  ;;  %v624_v59 = vrot.slane %v517_v58, %v2982_v19  ;;  %v635_v15 = vsel %vm632_vm0, %v465_v10, %v533_v12  ;;  %1890 = vmatprep.subr.bf16.mxu1 %v2555_v53  ;;  %s2565_s11 = smov 48  }
 0x2cf   : > { %606 = vrot.lane.b32.xlu0 %v602_v50, %s2556_s20  ;;  %v625_v63 = vcombine.high %v624_v59, %v624_v59  ;;  %v576_v2 = vpop.permute.xlu0 %575 }
 0x2d0   : > { %v578_v21 = vsel %vm577_vm4, %v574_v3, %v576_v2 }
 0x2d1   : > { %589 = vrot.lane.b32.xlu1 %v587_v54, %s2557_s12 }
 0x2d3   : > { %561 = vrot.lane.b32.xlu0 %v557_v56, %s2558_s24 }
 0x2d5   : > { %604 = vrot.lane.b32.xlu1 %v603_v57, %s2556_s20 }
 0x2d7   : > { %613 = vrot.lane.b32.xlu0 %v2996_v26, %s2559_s1 }
 0x2d9   : > { %559 = vrot.lane.b32.xlu1 %v558_v60, %s2558_s24 }
 0x2db   : > { %591 = vrot.lane.b32.xlu0 %v588_v61, %s2557_s12 }
 0x2dd   : > { %611 = vrot.lane.b32.xlu1 %v610_v62, %s2559_s1 }
 0x2df   : > { %628 = vrot.lane.b32.xlu0 %v625_v63, %s2561_s19 }
 0x2e1   : > { %626 = vrot.lane.b32.xlu1 %v624_v59, %s2561_s19 }
 0x33d   : > { %v546_v4 = vpop.permute.xlu0 %545 }
 0x33f   : > { %v544_v5 = vpop.permute.xlu1 %543 }
 0x340   : > { %v548_v13 = vsel %vm547_vm15, %v544_v5, %v546_v4 }
 0x341   : > { %v607_v6 = vpop.permute.xlu0 %606  ;;  %v638_v18 = vsel %vm636_vm2, %v635_v15, %v548_v13 }
 0x343   : > { %v590_v7 = vpop.permute.xlu1 %589 }
 0x345   : > { %v562_v9 = vpop.permute.xlu0 %561 }
 0x347   : > { %v605_v11 = vpop.permute.xlu1 %604 }
 0x348   : > { %v609_v23 = vsel %vm608_vm6, %v605_v11, %v607_v6 }
 0x349   : > { %v614_v14 = vpop.permute.xlu0 %613 }
 0x34b   : > { %v560_v16 = vpop.permute.xlu1 %559 }
 0x34c   : > { %v564_v17 = vsel %vm563_vm1, %v560_v16, %v562_v9 }
 0x34d   : > { %v592_v19 = vpop.permute.xlu0 %591  ;;  %v641_v20 = vsel %vm639_vm3, %v638_v18, %v564_v17 }
 0x34e   : > { %v594_v22 = vsel %vm593_vm5, %v590_v7, %v592_v19  ;;  %1873 = vmatpush3.bf16.msra.mxu0 %v641_v20 }
 0x34f   : > { %v645_v24 = vsel %vm632_vm0, %v578_v21, %v594_v22  ;;  %v612_v25 = vpop.permute.xlu1 %611  ;;  %1874 = vmatprep.subr.bf16.mxu0 %v2555_v53 }
 0x350   : > { %v616_v26 = vsel %vm615_vm7, %v612_v25, %v614_v14  ;;  %v647_v27 = vsel %vm636_vm2, %v645_v24, %v609_v23 }
 0x351   : > { %v649_v30 = vsel %vm639_vm3, %v647_v27, %v616_v26  ;;  %v629_v31 = vpop.permute.xlu0 %628 }
 0x352   : > { %1875 = vmatpush3.bf16.msra.mxu0 %v649_v30 }
 0x353   : > { %v627_v33 = vpop.permute.xlu1 %626  ;;  %1876 = vmatprep.subr.bf16.mxu0 %v2555_v53 }
 0x354   : > { %v631_v34 = vsel %vm630_vm10, %v627_v33, %v629_v31 }
 0x355   : > { %v653_v35 = vsel %vm632_vm0, %v631_v34, 1065369472 }
 0x356   : > { %v668_v36 = vand.u32 %v667_v32, %v653_v35 }
 0x358   : > { %1877 = vmatpush3.bf16.msra.mxu0 %v668_v36 }
 0x359   : > { %1898 = vmatprep.subr.bf16.mxu0 %v2555_v53 }
 0x35b   : > { %1879 = vmatmul.mubr.msk.bf16.vlgmr.msra.gmra.mrb[0].mxu0 %vm661_vm12, %v2250_v37 }
 0x35c   : > { %1902 = vmatprep.mubr.msk.bf16.mxu0 %vm2560_vm13, %v2555_v53  ;;  %1899 = vmatpush3.bf16.msra.mxu0 %v3045_v38 }
 0x35d   : > { %1900 = vmatprep.subr.bf16.mxu0 %v2555_v53 }
 0x360   : > { %1901 = vmatpush3.bf16.msra.mxu0 %v3051_v39 }
 0x361   : > { %1914 = vmatprep.subr.bf16.mxu0 %v2555_v53 }
 0x42e   : > { %v704_v40 = vpop.f32.mrb[0].mxu0 }
 0x42f   : > { %v716_v41 = vrot.slane %v704_v40, 4  ;;  %v1880_v42 = vpop.f32.mrb[1].mxu0 }
 0x430   : > { %v707_v43 = vpop.f32.mrb[2].mxu0 }
 0x431   : > { %v782_v44 = vrot.slane %v707_v43, 4  ;;  %717 = vrot.lane.b32.xlu1 %v716_v41, %s2547_s5  ;;  %v1881_v45 = vpop.f32.mrb[3].mxu0  ;;  %v2184_v46 = vpack.i.bf16 %v707_v43, %v704_v40 }
 0x433   : > { %783 = vrot.lane.b32.xlu0 %v782_v44, %s2547_s5  ;;  %v2194_v47 = vpack.i.bf16 %v782_v44, %v716_v41 }
 0x435   : > { %2185 = vrot.lane.b32.xlu1 %v2184_v46, %s2558_s24 }
 0x437   : > { %2190 = vrot.lane.b32.xlu0 %v2184_v46, %s2556_s20 }
 0x439   : > { %2195 = vrot.lane.b32.xlu1 %v2194_v47, %s2558_s24 }
 0x43b   : > { %2200 = vrot.lane.b32.xlu0 %v2184_v46, %s2563_s15 }
 0x43d   : > { %2205 = vrot.lane.b32.xlu1 %v2194_v47, %s2556_s20 }
 0x43f   : > { %2210 = vrot.lane.b32.xlu0 %v2184_v46, %s2564_s17 }
 0x441   : > { %2215 = vrot.lane.b32.xlu1 %v2194_v47, %s2563_s15 }
 0x443   : > { %2220 = vrot.lane.b32.xlu0 %v2184_v46, %s2565_s11 }
 0x445   : > { %2225 = vrot.lane.b32.xlu1 %v2194_v47, %s2564_s17 }
 0x447   : > { %2230 = vrot.lane.b32.xlu0 %v2184_v46, %s2550_s13 }
 0x449   : > { %2235 = vrot.lane.b32.xlu1 %v2194_v47, %s2565_s11  ;;  %s2371_s11 = scalar_lea.vmem %s3235_s7, 256 }
 0x44a   : > { %p2372_p10 = scmp.ne.s32.totalorder %s3235_s7, %s2371_s11 }
 0x44b   : > { %2240 = vrot.lane.b32.xlu0 %v2184_v46, %s2547_s5  ;;  %s3388_s5 = sld [smem:[#allocation18_spill]] }
 0x44d   : > { %2245 = vrot.lane.b32.xlu1 %v2194_v47, %s2550_s13 }
 0x451   : > { %s1815_s12 = sshll.u32 %s3388_s5, 2  ;;  %s2566_s5 = smov [#allocation11]  }
 0x4a3   : > { %v718_v48 = vpop.permute.xlu1 %717 }
 0x4a4   : > { %v721_v49 = vsel %vm493_vm9, %v704_v40, %v718_v48 }
 0x4a5   : > { %v722_v50 = vpack.c.bf16 %v721_v49, %v721_v49  ;;  %v784_v51 = vpop.permute.xlu0 %783 }
 0x4a6   : > { %v786_v55 = vsel %vm493_vm9, %v707_v43, %v784_v51 }
 0x4a7   : > { %1887 = vmatmul.mubr.msk.bf16.vlgmr.msra.gmra.mrb[0].mxu1 %vm507_vm11, %v722_v50  ;;  %v2186_v52 = vpop.permute.xlu1 %2185  ;;  %v787_v61 = vpack.c.bf16 %v786_v55, %v786_v55 }
 0x4a8   : > { %1891 = vmatpush3.bf16.msra.mxu1 %v3045_v38  ;;  %v2187_v54 = vunpack.i.l.bf16 %v2186_v52  ;;  %1894 = vmatprep.mubr.msk.bf16.mxu1 %vm2560_vm13, %v2555_v53  ;;  %v2188_v62 = vunpack.i.h.bf16 %v2186_v52 }
 0x4a9   : > { %1892 = vmatprep.subr.bf16.mxu1 %v2555_v53  ;;  %v2191_v58 = vpop.permute.xlu0 %2190 }
 0x4aa   : > { %v841_v56 = vsel %vm493_vm9, %v2187_v54, %v716_v41  ;;  %v2192_v63 = vunpack.i.l.bf16 %v2191_v58  ;;  %v896_v2 = vsel %vm493_vm9, %v2188_v62, %v782_v44  ;;  %v2193_v9 = vunpack.i.h.bf16 %v2191_v58 }
 0x4ab   : > { %v842_v57 = vpack.c.bf16 %v841_v56, %v841_v56  ;;  %v2196_v59 = vpop.permute.xlu1 %2195  ;;  %v897_v6 = vpack.c.bf16 %v896_v2, %v896_v2 }
 0x4ac   : > { %1893 = vmatpush3.bf16.msra.mxu1 %v3051_v39  ;;  %v2197_v60 = vunpack.i.l.bf16 %v2196_v59  ;;  %v2198_v7 = vunpack.i.h.bf16 %v2196_v59 }
 0x4ad   : > { %1903 = vmatmul.mubr.msk.bf16.vlgmr.msra.gmra.mrb[4].mxu0 %vm507_vm11, %v842_v57  ;;  %1906 = vmatprep.subr.bf16.mxu1 %v2555_v53  ;;  %v2201_v4 = vpop.permute.xlu0 %2200 }
 0x4ae   : > { %1915 = vmatpush3.bf16.msra.mxu0 %v3045_v38  ;;  %1918 = vmatprep.mubr.msk.bf16.mxu0 %vm2560_vm13, %v2555_v53  ;;  %v953_v0 = vsel %vm493_vm9, %v2192_v63, %v2197_v60  ;;  %v2202_v8 = vunpack.i.l.bf16 %v2201_v4  ;;  %v1005_v12 = vsel %vm493_vm9, %v2193_v9, %v2198_v7  ;;  %v2203_v19 = vunpack.i.h.bf16 %v2201_v4 }
 0x4af   : > { %1895 = vmatmul.mubr.msk.bf16.vlgmr.msra.gmra.mrb[4].mxu1 %vm507_vm11, %v787_v61  ;;  %1916 = vmatprep.subr.bf16.mxu0 %v2555_v53  ;;  %v2206_v1 = vpop.permute.xlu1 %2205  ;;  %v954_v3 = vpack.c.bf16 %v953_v0, %v953_v0  ;;  %v1006_v16 = vpack.c.bf16 %v1005_v12, %v1005_v12 }
 0x4b0   : > { %1907 = vmatpush3.bf16.msra.mxu1 %v3045_v38  ;;  %1910 = vmatprep.mubr.msk.bf16.mxu1 %vm2560_vm13, %v2555_v53  ;;  %v2207_v5 = vunpack.i.l.bf16 %v2206_v1  ;;  %v2208_v17 = vunpack.i.h.bf16 %v2206_v1 }
 0x4b1   : > { %1908 = vmatprep.subr.bf16.mxu1 %v2555_v53  ;;  %v2211_v14 = vpop.permute.xlu0 %2210 }
 0x4b2   : > { %1917 = vmatpush3.bf16.msra.mxu0 %v3051_v39  ;;  %v1061_v10 = vsel %vm493_vm9, %v2202_v8, %v2207_v5  ;;  %v2212_v18 = vunpack.i.l.bf16 %v2211_v14  ;;  %v1117_v22 = vsel %vm493_vm9, %v2203_v19, %v2208_v17  ;;  %v2213_v29 = vunpack.i.h.bf16 %v2211_v14 }
 0x4b3   : > { %1930 = vmatprep.subr.bf16.mxu0 %v2555_v53  ;;  %v2216_v11 = vpop.permute.xlu1 %2215  ;;  %v1062_v13 = vpack.c.bf16 %v1061_v10, %v1061_v10  ;;  %v1118_v26 = vpack.c.bf16 %v1117_v22, %v1117_v22 }
 0x4b4   : > { %1909 = vmatpush3.bf16.msra.mxu1 %v3051_v39  ;;  %v2217_v15 = vunpack.i.l.bf16 %v2216_v11  ;;  %v2218_v27 = vunpack.i.h.bf16 %v2216_v11 }
 0x4b5   : > { %1919 = vmatmul.mubr.msk.bf16.vlgmr.msra.gmra.mrb[8].mxu0 %vm507_vm11, %v954_v3  ;;  %1922 = vmatprep.subr.bf16.mxu1 %v2555_v53  ;;  %v2221_v24 = vpop.permute.xlu0 %2220 }
 0x4b6   : > { %1931 = vmatpush3.bf16.msra.mxu0 %v3045_v38  ;;  %1934 = vmatprep.mubr.msk.bf16.mxu0 %vm2560_vm13, %v2555_v53  ;;  %v1173_v20 = vsel %vm493_vm9, %v2212_v18, %v2217_v15  ;;  %v2222_v28 = vunpack.i.l.bf16 %v2221_v24  ;;  %v1225_v32 = vsel %vm493_vm9, %v2213_v29, %v2218_v27  ;;  %v2223_v41 = vunpack.i.h.bf16 %v2221_v24 }
 0x4b7   : > { %1911 = vmatmul.mubr.msk.bf16.vlgmr.msra.gmra.mrb[8].mxu1 %vm507_vm11, %v897_v6  ;;  %1932 = vmatprep.subr.bf16.mxu0 %v2555_v53  ;;  %v2226_v21 = vpop.permute.xlu1 %2225  ;;  %v1174_v23 = vpack.c.bf16 %v1173_v20, %v1173_v20  ;;  %v1226_v36 = vpack.c.bf16 %v1225_v32, %v1225_v32 }
 0x4b8   : > { %1923 = vmatpush3.bf16.msra.mxu1 %v3045_v38  ;;  %1926 = vmatprep.mubr.msk.bf16.mxu1 %vm2560_vm13, %v2555_v53  ;;  %v2227_v25 = vunpack.i.l.bf16 %v2226_v21  ;;  %v2228_v37 = vunpack.i.h.bf16 %v2226_v21 }
 0x4b9   : > { %1924 = vmatprep.subr.bf16.mxu1 %v2555_v53  ;;  %v2231_v34 = vpop.permute.xlu0 %2230 }
 0x4ba   : > { %1933 = vmatpush3.bf16.msra.mxu0 %v3051_v39  ;;  %v1281_v30 = vsel %vm493_vm9, %v2222_v28, %v2227_v25  ;;  %v2232_v40 = vunpack.i.l.bf16 %v2231_v34  ;;  %v1337_v44 = vsel %vm493_vm9, %v2223_v41, %v2228_v37  ;;  %v2233_v51 = vunpack.i.h.bf16 %v2231_v34 }
 0x4bb   : > { %1946 = vmatprep.subr.bf16.mxu0 %v2555_v53  ;;  %v2236_v31 = vpop.permute.xlu1 %2235  ;;  %v1282_v33 = vpack.c.bf16 %v1281_v30, %v1281_v30  ;;  %v1338_v48 = vpack.c.bf16 %v1337_v44, %v1337_v44 }
 0x4bc   : > { %1925 = vmatpush3.bf16.msra.mxu1 %v3051_v39  ;;  %v2237_v35 = vunpack.i.l.bf16 %v2236_v31  ;;  %v2238_v49 = vunpack.i.h.bf16 %v2236_v31 }
 0x4bd   : > { %1935 = vmatmul.mubr.msk.bf16.vlgmr.msra.gmra.mrb[12].mxu0 %vm507_vm11, %v1062_v13  ;;  %1938 = vmatprep.subr.bf16.mxu1 %v2555_v53  ;;  %v2241_v46 = vpop.permute.xlu0 %2240 }
 0x4be   : > { %1947 = vmatpush3.bf16.msra.mxu0 %v3045_v38  ;;  %1950 = vmatprep.mubr.msk.bf16.mxu0 %vm2560_vm13, %v2555_v53  ;;  %v1393_v42 = vsel %vm493_vm9, %v2232_v40, %v2237_v35  ;;  %v2242_v50 = vunpack.i.l.bf16 %v2241_v46  ;;  %v1445_v54 = vsel %vm493_vm9, %v2233_v51, %v2238_v49  ;;  %v2243_v58 = vunpack.i.h.bf16 %v2241_v46 }
 0x4bf   : > { %1927 = vmatmul.mubr.msk.bf16.vlgmr.msra.gmra.mrb[12].mxu1 %vm507_vm11, %v1006_v16  ;;  %1948 = vmatprep.subr.bf16.mxu0 %v2555_v53  ;;  %v2246_v43 = vpop.permute.xlu1 %2245  ;;  %v1394_v45 = vpack.c.bf16 %v1393_v42, %v1393_v42  ;;  %v1446_v56 = vpack.c.bf16 %v1445_v54, %v1445_v54 }
 0x4c0   : > { %1939 = vmatpush3.bf16.msra.mxu1 %v3045_v38  ;;  %1942 = vmatprep.mubr.msk.bf16.mxu1 %vm2560_vm13, %v2555_v53  ;;  %v2247_v47 = vunpack.i.l.bf16 %v2246_v43  ;;  %v2248_v57 = vunpack.i.h.bf16 %v2246_v43 }
 0x4c1   : > { %1940 = vmatprep.subr.bf16.mxu1 %v2555_v53 }
 0x4c2   : > { %1949 = vmatpush3.bf16.msra.mxu0 %v3051_v39  ;;  %v1501_v52 = vsel %vm493_vm9, %v2242_v50, %v2247_v47  ;;  %v1557_v59 = vsel %vm493_vm9, %v2243_v58, %v2248_v57  ;;  %vm835_vm9 = vcmask 519424  }
 0x4c3   : > { %1962 = vmatprep.subr.bf16.mxu0 %v2555_v53  ;;  %v1502_v55 = vpack.c.bf16 %v1501_v52, %v1501_v52  ;;  %v1558_v60 = vpack.c.bf16 %v1557_v59, %v1557_v59 }
 0x4c4   : > { %1941 = vmatpush3.bf16.msra.mxu1 %v3051_v39 }
 0x4c5   : > { %1951 = vmatmul.mubr.msk.bf16.vlgmr.msra.gmra.mrb[16].mxu0 %vm507_vm11, %v1174_v23  ;;  %1954 = vmatprep.subr.bf16.mxu1 %v2555_v53 }
 0x4c6   : > { %1963 = vmatpush3.bf16.msra.mxu0 %v3045_v38  ;;  %1966 = vmatprep.mubr.msk.bf16.mxu0 %vm2560_vm13, %v2555_v53 }
 0x4c7   : > { %1943 = vmatmul.mubr.msk.bf16.vlgmr.msra.gmra.mrb[16].mxu1 %vm507_vm11, %v1118_v26  ;;  %1964 = vmatprep.subr.bf16.mxu0 %v2555_v53 }
 0x4c8   : > { %1955 = vmatpush3.bf16.msra.mxu1 %v3045_v38  ;;  %1958 = vmatprep.mubr.msk.bf16.mxu1 %vm2560_vm13, %v2555_v53 }
 0x4c9   : > { %1956 = vmatprep.subr.bf16.mxu1 %v2555_v53 }
 0x4ca   : > { %1965 = vmatpush3.bf16.msra.mxu0 %v3051_v39 }
 0x4cb   : > { %1978 = vmatprep.subr.bf16.mxu0 %v2555_v53 }
 0x4cc   : > { %1957 = vmatpush3.bf16.msra.mxu1 %v3051_v39 }
 0x4cd   : > { %1967 = vmatmul.mubr.msk.bf16.vlgmr.msra.gmra.mrb[20].mxu0 %vm507_vm11, %v1282_v33  ;;  %1970 = vmatprep.subr.bf16.mxu1 %v2555_v53 }
 0x4ce   : > { %1979 = vmatpush3.bf16.msra.mxu0 %v3045_v38  ;;  %1982 = vmatprep.mubr.msk.bf16.mxu0 %vm2560_vm13, %v2555_v53 }
 0x4cf   : > { %1959 = vmatmul.mubr.msk.bf16.vlgmr.msra.gmra.mrb[20].mxu1 %vm507_vm11, %v1226_v36  ;;  %1980 = vmatprep.subr.bf16.mxu0 %v2555_v53 }
 0x4d0   : > { %1971 = vmatpush3.bf16.msra.mxu1 %v3045_v38  ;;  %1974 = vmatprep.mubr.msk.bf16.mxu1 %vm2560_vm13, %v2555_v53 }
 0x4d1   : > { %1972 = vmatprep.subr.bf16.mxu1 %v2555_v53 }
 0x4d2   : > { %1981 = vmatpush3.bf16.msra.mxu0 %v3051_v39 }
 0x4d3   : > { %1994 = vmatprep.subr.bf16.mxu0 %v2555_v53 }
 0x4d4   : > { %1973 = vmatpush3.bf16.msra.mxu1 %v3051_v39 }
 0x4d5   : > { %1983 = vmatmul.mubr.msk.bf16.vlgmr.msra.gmra.mrb[24].mxu0 %vm507_vm11, %v1394_v45  ;;  %1986 = vmatprep.subr.bf16.mxu1 %v2555_v53 }
 0x4d6   : > { %1995 = vmatpush3.bf16.msra.mxu0 %v3045_v38  ;;  %1998 = vmatprep.mubr.msk.bf16.mxu0 %vm2560_vm13, %v2555_v53 }
 0x4d7   : > { %1975 = vmatmul.mubr.msk.bf16.vlgmr.msra.gmra.mrb[24].mxu1 %vm507_vm11, %v1338_v48  ;;  %1996 = vmatprep.subr.bf16.mxu0 %v2555_v53 }
 0x4d8   : > { %1987 = vmatpush3.bf16.msra.mxu1 %v3045_v38  ;;  %1990 = vmatprep.mubr.msk.bf16.mxu1 %vm2560_vm13, %v2555_v53 }
 0x4d9   : > { %1988 = vmatprep.subr.bf16.mxu1 %v2555_v53 }
 0x4da   : > { %1997 = vmatpush3.bf16.msra.mxu0 %v3051_v39 }
 0x4dc   : > { %1989 = vmatpush3.bf16.msra.mxu1 %v3051_v39 }
 0x4dd   : > { %1999 = vmatmul.mubr.msk.bf16.vlgmr.msra.gmra.mrb[28].mxu0 %vm507_vm11, %v1502_v55  ;;  %2002 = vmatprep.subr.bf16.mxu1 %v2555_v53 }
 0x4df   : > { %1991 = vmatmul.mubr.msk.bf16.vlgmr.msra.gmra.mrb[28].mxu1 %vm507_vm11, %v1446_v56 }
 0x4e0   : > { %2003 = vmatpush3.bf16.msra.mxu1 %v3045_v38  ;;  %2006 = vmatprep.mubr.msk.bf16.mxu1 %vm2560_vm13, %v2555_v53  ;;  %vm945_vm13 = vcmask 1044224  }
 0x4e1   : > { %2004 = vmatprep.subr.bf16.mxu1 %v2555_v53 }
 0x4e4   : > { %2005 = vmatpush3.bf16.msra.mxu1 %v3051_v39 }
 0x4e7   : > { %2007 = vmatmul.mubr.msk.bf16.vlgmr.msra.gmra.mrb[32].mxu1 %vm507_vm11, %v1558_v60  ;;  %vm890_vm11 = vcmask 781824  }
 0x57a   : > { %v773_v61 = vpop.f32.mrb[0].mxu1 }
 0x57b   : > { %780 = vst.msk [vmem:[%s2969_s16] sm:$0xf] %vm779_vm14, %v773_v61  ;;  %v1888_v62 = vpop.f32.mrb[1].mxu1 }
 0x57c   : > { %v776_v63 = vpop.f32.mrb[2].mxu1 }
 0x57d   : > { %v1889_v38 = vpop.f32.mrb[3].mxu1 }
 0x580   : > { %v880_v0 = vpop.f32.mrb[4].mxu0 }
 0x581   : > { %887 = vrot.lane.b32.xlu0 %v880_v0, %s2564_s17  ;;  %v1904_v1 = vpop.f32.mrb[5].mxu0 }
 0x582   : > { %v825_v53 = vpop.f32.mrb[4].mxu1  ;;  %v883_v2 = vpop.f32.mrb[6].mxu0 }
 0x583   : > { %v1896_v3 = vpop.f32.mrb[5].mxu1  ;;  %v1905_v4 = vpop.f32.mrb[7].mxu0 }
 0x584   : > { %v828_v39 = vpop.f32.mrb[6].mxu1 }
 0x585   : > { %v1897_v5 = vpop.f32.mrb[7].mxu1  ;;  %832 = vrot.lane.b32.xlu0 %v825_v53, %s2550_s13 }
 0x588   : > { %v992_v6 = vpop.f32.mrb[8].mxu0 }
 0x589   : > { %998 = vst.msk [vmem:[%s2969_s16 + $0x4] sm:$0xf] %vm779_vm14, %v992_v6  ;;  %v1920_v7 = vpop.f32.mrb[9].mxu0 }
 0x58a   : > { %v935_v8 = vpop.f32.mrb[8].mxu1  ;;  %v995_v9 = vpop.f32.mrb[10].mxu0 }
 0x58b   : > { %v1912_v10 = vpop.f32.mrb[9].mxu1  ;;  %942 = vrot.lane.b32.xlu0 %v935_v8, %s2556_s20  ;;  %v1921_v11 = vpop.f32.mrb[11].mxu0 }
 0x58c   : > { %v938_v12 = vpop.f32.mrb[10].mxu1 }
 0x58d   : > { %v1913_v13 = vpop.f32.mrb[11].mxu1 }
 0x590   : > { %v1100_v14 = vpop.f32.mrb[12].mxu0 }
 0x591   : > { %1107 = vrot.lane.b32.xlu1 %v1100_v14, %s2564_s17  ;;  %v1936_v15 = vpop.f32.mrb[13].mxu0 }
 0x592   : > { %v1044_v16 = vpop.f32.mrb[12].mxu1  ;;  %v1103_v17 = vpop.f32.mrb[14].mxu0 }
 0x593   : > { %v1928_v18 = vpop.f32.mrb[13].mxu1  ;;  %v1937_v19 = vpop.f32.mrb[15].mxu0 }
 0x594   : > { %v1047_v20 = vpop.f32.mrb[14].mxu1 }
 0x595   : > { %v1929_v21 = vpop.f32.mrb[15].mxu1  ;;  %1051 = vrot.lane.b32.xlu1 %v1044_v16, %s2550_s13 }
 0x598   : > { %v1212_v22 = vpop.f32.mrb[16].mxu0 }
 0x599   : > { %1218 = vst.msk [vmem:[%s2969_s16 + $0x8] sm:$0xf] %vm779_vm14, %v1212_v22  ;;  %v1952_v23 = vpop.f32.mrb[17].mxu0 }
 0x59a   : > { %v1156_v24 = vpop.f32.mrb[16].mxu1  ;;  %v1215_v25 = vpop.f32.mrb[18].mxu0 }
 0x59b   : > { %v1944_v26 = vpop.f32.mrb[17].mxu1  ;;  %1163 = vrot.lane.b32.xlu1 %v1156_v24, %s2556_s20  ;;  %v1953_v27 = vpop.f32.mrb[19].mxu0 }
 0x59c   : > { %v1159_v28 = vpop.f32.mrb[18].mxu1 }
 0x59d   : > { %v1945_v29 = vpop.f32.mrb[19].mxu1 }
 0x5a0   : > { %v1320_v30 = vpop.f32.mrb[20].mxu0 }
 0x5a1   : > { %1327 = vrot.lane.b32.xlu0 %v1320_v30, %s2564_s17  ;;  %v1968_v31 = vpop.f32.mrb[21].mxu0 }
 0x5a2   : > { %v1264_v32 = vpop.f32.mrb[20].mxu1  ;;  %v1323_v33 = vpop.f32.mrb[22].mxu0 }
 0x5a3   : > { %v1960_v34 = vpop.f32.mrb[21].mxu1  ;;  %v1969_v35 = vpop.f32.mrb[23].mxu0 }
 0x5a4   : > { %v1267_v36 = vpop.f32.mrb[22].mxu1 }
 0x5a5   : > { %v1961_v37 = vpop.f32.mrb[23].mxu1  ;;  %1271 = vrot.lane.b32.xlu0 %v1264_v32, %s2550_s13 }
 0x5a8   : > { %v1432_v40 = vpop.f32.mrb[24].mxu0 }
 0x5a9   : > { %1438 = vst.msk [vmem:[%s2969_s16 + $0xc] sm:$0xf] %vm779_vm14, %v1432_v40  ;;  %v1984_v41 = vpop.f32.mrb[25].mxu0 }
 0x5aa   : > { %v1376_v42 = vpop.f32.mrb[24].mxu1  ;;  %v1435_v43 = vpop.f32.mrb[26].mxu0 }
 0x5ab   : > { %v1976_v44 = vpop.f32.mrb[25].mxu1  ;;  %1383 = vrot.lane.b32.xlu0 %v1376_v42, %s2556_s20  ;;  %v1985_v45 = vpop.f32.mrb[27].mxu0 }
 0x5ac   : > { %v1379_v46 = vpop.f32.mrb[26].mxu1 }
 0x5ad   : > { %v1977_v47 = vpop.f32.mrb[27].mxu1 }
 0x5b0   : > { %v1540_v48 = vpop.f32.mrb[28].mxu0 }
 0x5b1   : > { %1547 = vrot.lane.b32.xlu1 %v1540_v48, %s2564_s17  ;;  %v2000_v49 = vpop.f32.mrb[29].mxu0  ;;  %s1608_s17 = scalar_lea.sflag [#allocation5], %s2949_s27 }
 0x5b2   : > { %v1484_v50 = vpop.f32.mrb[28].mxu1  ;;  %v1543_v51 = vpop.f32.mrb[30].mxu0 }
 0x5b3   : > { %v1992_v52 = vpop.f32.mrb[29].mxu1  ;;  %v2001_v54 = vpop.f32.mrb[31].mxu0 }
 0x5b4   : > { %v1487_v55 = vpop.f32.mrb[30].mxu1 }
 0x5b5   : > { %v1993_v56 = vpop.f32.mrb[31].mxu1  ;;  %1491 = vrot.lane.b32.xlu1 %v1484_v50, %s2550_s13  ;;  %s3389_s13 = sld [smem:[#allocation19_spill]] }
 0x5ba   : > { %v1596_v57 = vpop.f32.mrb[32].mxu1 }
 0x5bb   : > { %v2008_v58 = vpop.f32.mrb[33].mxu1  ;;  %1603 = vrot.lane.b32.xlu1 %v1596_v57, %s2556_s20  ;;  %s3390_s20 = sld [smem:[#allocation22_spill]]  ;;  %s1816_s24 = sshll.u32 %s3389_s13, 3 }
 0x5bc   : > { %v1599_v59 = vpop.f32.mrb[34].mxu1  ;;  %s1620_s1 = sadd.s32 %s1816_s24, %s1815_s12  ;;  %s2375_s13 = sshll.u32 %s2566_s5, 4  ;;  %s2376_s13 = int_to_ptr.vmem [resolvable:$false] %s2375_s13 }
 0x5bd   : > { %v2009_v60 = vpop.f32.mrb[35].mxu1  ;;  %s1817_s19 = sshll.u32 %s1620_s1, 6  ;;  %s2377_s12 = scalar_lea.vmem %s2376_s13, 512 }
 0x5be   : > { %s3233_s15 = scalar_lea.hbm %s3391_s14, %s1817_s19  ;;  %p2378_p8 = scmp.lt.s32.totalorder %s3235_s7, %s2376_s13 }
 0x5bf   : > { %p2379_p12 = scmp.lt.s32.totalorder %s2377_s12, %s2371_s11 }
 0x5c1   : > { %p3392_p7 = scmp.ne.s32.totalorder %s3390_s20, 0  ;;  %p2380_p6 = por %p2379_p12, %p2378_p8 }
 0x5c3   : > { %p2373_p4 = pnand %p2372_p10, %p3392_p7 }
 0x5c5   : > { %p2374_p9 = pneg %p2373_p4 }
 0x5c7   : > { %p2381_p5 = pnand %p2380_p6, %p2374_p9 }
 0x5f3   : > { %v888_v61 = vpop.permute.xlu0 %887 }
 0x5f7   : > { %v833_v62 = vpop.permute.xlu0 %832 }
 0x5f8   : > { %836 = vst.msk [vmem:[%s2969_s16] sm:$0xf] %vm835_vm9, %v833_v62 }
 0x5f9   : > { %891 = vst.msk [vmem:[%s2969_s16] sm:$0xf] %vm890_vm11, %v888_v61 }
 0x5fd   : > { %v943_v63 = vpop.permute.xlu0 %942 }
 0x5fe   : > { %946 = vst.msk [vmem:[%s2969_s16] sm:$0xf] %vm945_vm13, %v943_v63 }
 0x603   : > { %v1108_v38 = vpop.permute.xlu1 %1107 }
 0x607   : > { %v1052_v0 = vpop.permute.xlu1 %1051 }
 0x608   : > { %1054 = vst.msk [vmem:[%s2969_s16 + $0x4] sm:$0xf] %vm835_vm9, %v1052_v0 }
 0x609   : > { %1110 = vst.msk [vmem:[%s2969_s16 + $0x4] sm:$0xf] %vm890_vm11, %v1108_v38 }
 0x60d   : > { %v1164_v1 = vpop.permute.xlu1 %1163 }
 0x60e   : > { %1166 = vst.msk [vmem:[%s2969_s16 + $0x4] sm:$0xf] %vm945_vm13, %v1164_v1 }
 0x613   : > { %v1328_v53 = vpop.permute.xlu0 %1327 }
 0x617   : > { %v1272_v2 = vpop.permute.xlu0 %1271 }
 0x618   : > { %1274 = vst.msk [vmem:[%s2969_s16 + $0x8] sm:$0xf] %vm835_vm9, %v1272_v2 }
 0x619   : > { %1330 = vst.msk [vmem:[%s2969_s16 + $0x8] sm:$0xf] %vm890_vm11, %v1328_v53 }
 0x61d   : > { %v1384_v3 = vpop.permute.xlu0 %1383 }
 0x61e   : > { %1386 = vst.msk [vmem:[%s2969_s16 + $0x8] sm:$0xf] %vm945_vm13, %v1384_v3 }
 0x623   : > { %v1548_v4 = vpop.permute.xlu1 %1547 }
 0x627   : > { %v1492_v39 = vpop.permute.xlu1 %1491 }
 0x628   : > { %1494 = vst.msk [vmem:[%s2969_s16 + $0xc] sm:$0xf] %vm835_vm9, %v1492_v39 }
 0x629   : > { %1550 = vst.msk [vmem:[%s2969_s16 + $0xc] sm:$0xf] %vm890_vm11, %v1548_v4 }
 0x62d   : > { %v1604_v5 = vpop.permute.xlu1 %1603 }
 0x62e   : > { %1606 = vst.msk [vmem:[%s2969_s16 + $0xc] sm:$0xf] %vm945_vm13, %v1604_v5 }
 0x62f   : > { %2384 = shalt.err (!%p2381_p5)
}
 0x630   : > { %s2385_s27 = scalar_lea.hbm %s3233_s15, 256  ;;  %s2389_s1 = scalar_lea.hbm %s3391_s14, 1024 }
 0x631   : > { %p2386_p2 = scmp.ne.s32.totalorder %s3233_s15, %s2385_s27  ;;  %p2390_p3 = scmp.lt.u32.totalorder %s3233_s15, %s3391_s14 }
 0x632   : > { %p2391_p11 = scmp.lt.u32.totalorder %s2389_s1, %s2385_s27  ;;  %p2393_p10 = scmp.lt.u32.totalorder %s2385_s27, %s3233_s15 }
 0x633   : > { %p2387_p0 = pnand %p2386_p2, %p3392_p7 }
 0x634   : > { %p2392_p1 = por %p2391_p11, %p2390_p3 }
 0x635   : > { %p2388_p13 = pneg %p2387_p0 }
 0x636   : > { %p2394_p4 = por %p2393_p10, %p2392_p1 }
 0x638   : > { %p2395_p9 = pnand %p2394_p4, %p2388_p13 }
 0x63a   : > { %2398 = shalt.err (!%p2395_p9)
}
 0x63b   : > { %2020 = dma.vmem_to_hbm [thread:$0]  (%p3392_p7), %s3235_s7, 256, %s3233_s15, %s1608_s17  }
 0x63c PF: > { %s3393_s6 = sld [smem:[#allocation17_spill]]  ;;  %s3394_s11 = sld [smem:[#allocation23_spill]] }
 0x63d   : > { %p2043_p8 = scmp.ge.s32.totalorder %s2533_s10, 2 }
 0x642   : > { %s1636_s5 = sand.u32 1, %s3393_s6   ;;  %p3395_p12 = scmp.ne.s32.totalorder %s3394_s11, 0 }
 0x643   : > { %s1637_s13 = scalar_lea.sflag [#allocation5], %s1636_s5 }
 0x644   : > { %p2037_p6 = pnand %p2043_p8, %p3395_p12 }
 0x646   : > { %2472 = dma.done.wait (!%p2037_p6), %s1637_s13, 256  }
 0x647   : > { %2474 = vsyncadd (!%p2037_p6), %s1637_s13, 4294967040  ;;  %s26_s10 = sadd.s32 1, %s2533_s10   ;;  %s3397_s20 = sld [smem:[#allocation20_spill]] }
 0x648   : > { %p3266_p5 = scmp.ge.s32.totalorder %s26_s10, 6   ;;  %s3398_s15 = sld [smem:[#allocation24_spill]] }
 0x649   : > { %s3399_s21 = smov %s2485_s22  ;;  %s3400_s22 = smov %s2489_s23 }
 0x64a   : > { %s3401_s23 = smov %s2896_s30  ;;  %s3402_s24 = smov %s2497_s25 }
 0x64b   : > { %s3403_s25 = smov %s2501_s26  ;;  %s3404_s26 = smov %s2832_s18 }
 0x64c   : > { %s3405_s27 = smov %s2509_s28  ;;  %s3406_s28 = smov %s2513_s29 }
 0x64d   : > { %s3407_s29 = smov %s2827_s4  ;;  %s3408_s30 = smov %s2525_s8 }
 0x64e   : > { %s3409_s7 = smov %s2529_s9  ;;  %s3410_s8 = smov %s3397_s20 }
 0x64f   : > { %s3411_s9 = smov %s3398_s15  ;;  %25 = sbr.rel (!%p3266_p5) target bundleno = 19 (0x13), region = 133 }
 0x656   :  { %1642 = vsyncpa [#allocation4], 1 }
 0x657   :  { %1644 = vsyncpa [#allocation4 + $0x1], 1 }
 0x658   :  { %1645 = vsyncpa [#allocation7], 1 }
 0x659   :  { %1647 = vsyncpa [#allocation7 + $0x1], 1 }
 0x65a   :  { %1648 = vsyncpa [#allocation10], 1 }
 0x65b   :  { %1649 = vsyncpa [#allocation5], 1 }
 0x65c   :  { %1651 = vsyncpa [#allocation5 + $0x1], 1 }

</bundles_post_ra>
